<compile_context>
chip_gen: v7x
topology: tpu7x:2x2x1
jax: 0.10.0
libtpu: 0.0.40
codegen_flags: <defaults>
</compile_context>

<pallas_src>
import math
from functools import partial

import jax
import jax.numpy as jnp
from jax.experimental import pallas as pl
from jax.experimental.pallas import tpu as pltpu


# ------------------------------- tiling helpers ------------------------------

TM_CAP = 512    # rows per matmul tile
TN_CAP = 512    # output cols per matmul tile
TK_CAP = 1024   # reduction cols per matmul tile
LN_ROW_CAP = 1024


def _default_vmem_limit():
    """Scoped VMEM limit with headroom: ~3/4 of physical, capped at 96 MiB.
    Respects v7x's 64 MiB physical VMEM while using v5e/v6e's 128 MiB."""
    try:
        cap = pltpu.get_tpu_info().vmem_capacity_bytes
    except Exception:
        cap = 64 * 1024 * 1024
    return int(min(cap * 3 // 4, 96 * 1024 * 1024))


VMEM_LIMIT = _default_vmem_limit()


def _pick_block(dim, cap, align=128):
    """Largest aligned divisor of `dim` <= cap (prefers 256-multiples for the
    v6e/v7x 256-wide MXU), else the full dim."""
    if dim <= cap:
        return dim
    aligns = (256, align) if align < 256 else (align,)
    for a in aligns:
        b = (cap // a) * a
        while b >= a:
            if dim % b == 0:
                return b
            b -= a
    # TODO(synk): pad ragged dims / emit remainder blocks instead of whole-dim fallback.
    return dim


# ----------------------------- Pallas kernels --------------------------------

def _linear_kernel(x_ref, w_ref, b_ref, o_ref, acc_ref, *, activation):
    """Tiled matmul + bias (+ optional ReLU). Grid = (M/tm, N/tn, K/tk).
    x and w are bf16; accumulation in f32."""
    k = pl.program_id(2)

    @pl.when(k == 0)
    def _():
        acc_ref[...] = jnp.zeros_like(acc_ref)

    acc_ref[...] += jnp.dot(x_ref[...], w_ref[...],
                            preferred_element_type=jnp.float32)

    @pl.when(k == pl.num_programs(2) - 1)
    def _():
        y = acc_ref[...] + b_ref[...]
        if activation == "relu":
            y = jnp.maximum(y, 0.0)
        o_ref[...] = y.astype(o_ref.dtype)


def linear(x, w, b, activation=None, out_dtype=jnp.bfloat16):
    """x: (M, K) bf16 @ w: (K, N) bf16 + b: (N,) f32 -> (M, N) out_dtype."""
    M, K = x.shape
    N = w.shape[1]
    tm = _pick_block(M, TM_CAP, 8)
    tn = _pick_block(N, TN_CAP, 128)
    tk = _pick_block(K, TK_CAP, 128)
    return pl.pallas_call(
        partial(_linear_kernel, activation=activation),
        out_shape=jax.ShapeDtypeStruct((M, N), out_dtype),
        grid=(M // tm, N // tn, K // tk),
        in_specs=[
            pl.BlockSpec((tm, tk), lambda i, j, k: (i, k)),
            pl.BlockSpec((tk, tn), lambda i, j, k: (k, j)),
            pl.BlockSpec((1, tn), lambda i, j, k: (0, j)),
        ],
        out_specs=pl.BlockSpec((tm, tn), lambda i, j, k: (i, j)),
        scratch_shapes=[pltpu.VMEM((tm, tn), jnp.float32)],
        compiler_params=pltpu.CompilerParams(
            dimension_semantics=("parallel", "parallel", "arbitrary"),
            vmem_limit_bytes=VMEM_LIMIT),
    )(x, w, b.reshape(1, N))


def _matmul_res_ln_kernel(x_ref, w_ref, b_ref, r_ref, g_ref, bb_ref, o_ref,
                          acc_ref, *, eps):
    """Tiled matmul + bias, fused residual-add + LayerNorm epilogue (f32 math).
    Grid = (M/tm, K/tk); N (= E) kept whole so LN sees the full row."""
    k = pl.program_id(1)

    @pl.when(k == 0)
    def _():
        acc_ref[...] = jnp.zeros_like(acc_ref)

    acc_ref[...] += jnp.dot(x_ref[...], w_ref[...],
                            preferred_element_type=jnp.float32)

    @pl.when(k == pl.num_programs(1) - 1)
    def _():
        y = acc_ref[...] + b_ref[...] + r_ref[...].astype(jnp.float32)
        mu = jnp.mean(y, axis=-1, keepdims=True)
        yc = y - mu
        var = jnp.mean(yc * yc, axis=-1, keepdims=True)
        o_ref[...] = (yc * jax.lax.rsqrt(var + eps) * g_ref[...]
                      + bb_ref[...]).astype(o_ref.dtype)


def matmul_residual_layernorm(x, w, b, resid, gamma, beta, eps=1e-5):
    """bf16 LayerNorm(resid + x @ w + b) over the last axis. x: (M, K) bf16."""
    M, K = x.shape
    N = w.shape[1]
    tm = _pick_block(M, TM_CAP, 8)
    tk = _pick_block(K, TK_CAP, 128)
    return pl.pallas_call(
        partial(_matmul_res_ln_kernel, eps=eps),
        out_shape=jax.ShapeDtypeStruct((M, N), jnp.bfloat16),
        grid=(M // tm, K // tk),
        in_specs=[
            pl.BlockSpec((tm, tk), lambda i, k: (i, k)),
            pl.BlockSpec((tk, N), lambda i, k: (k, 0)),
            pl.BlockSpec((1, N), lambda i, k: (0, 0)),
            pl.BlockSpec((tm, N), lambda i, k: (i, 0)),
            pl.BlockSpec((1, N), lambda i, k: (0, 0)),
            pl.BlockSpec((1, N), lambda i, k: (0, 0)),
        ],
        out_specs=pl.BlockSpec((tm, N), lambda i, k: (i, 0)),
        scratch_shapes=[pltpu.VMEM((tm, N), jnp.float32)],
        compiler_params=pltpu.CompilerParams(
            dimension_semantics=("parallel", "arbitrary"),
            vmem_limit_bytes=VMEM_LIMIT),
    )(x, w, b.reshape(1, N), resid, gamma.reshape(1, N), beta.reshape(1, N))


def _ffn_kernel(x_ref, w1_ref, b1_ref, w2_ref, b2_ref, g_ref, bb_ref, o_ref,
                acc_ref, *, eps):
    """Fully fused FFN: LN(x + ReLU(x@W1+b1)@W2+b2). Grid = (M/tm, dff/tf).
    x is bf16 already (no per-step cast); the residual is the same x block."""
    j = pl.program_id(1)

    @pl.when(j == 0)
    def _():
        acc_ref[...] = jnp.zeros_like(acc_ref)

    h = jnp.dot(x_ref[...], w1_ref[...], preferred_element_type=jnp.float32)
    h = jnp.maximum(h + b1_ref[...], 0.0)
    acc_ref[...] += jnp.dot(h.astype(jnp.bfloat16), w2_ref[...],
                            preferred_element_type=jnp.float32)

    @pl.when(j == pl.num_programs(1) - 1)
    def _():
        y = acc_ref[...] + b2_ref[...] + x_ref[...].astype(jnp.float32)
        mu = jnp.mean(y, axis=-1, keepdims=True)
        yc = y - mu
        var = jnp.mean(yc * yc, axis=-1, keepdims=True)
        o_ref[...] = (yc * jax.lax.rsqrt(var + eps) * g_ref[...]
                      + bb_ref[...]).astype(o_ref.dtype)


def ffn_residual_layernorm(x, w1, b1, w2, b2, gamma, beta, eps=1e-5):
    """x: (M, E) bf16, w1: (E, dff) bf16, w2: (dff, E) bf16 -> (M, E) bf16."""
    M, E = x.shape
    dff = w1.shape[1]
    tm = _pick_block(M, TM_CAP, 8)
    # Keep the inner tile modest for very large E so the v7x (64 MiB VMEM) working
    # set (W1/W2 tiles + (tm,E) x/acc/out) stays under the scoped ceiling.
    tf_cap = 256 if E >= 4096 else TK_CAP
    tf = _pick_block(dff, tf_cap, 128)
    return pl.pallas_call(
        partial(_ffn_kernel, eps=eps),
        out_shape=jax.ShapeDtypeStruct((M, E), jnp.bfloat16),
        grid=(M // tm, dff // tf),
        in_specs=[
            pl.BlockSpec((tm, E), lambda i, j: (i, 0)),
            pl.BlockSpec((E, tf), lambda i, j: (0, j)),
            pl.BlockSpec((1, tf), lambda i, j: (0, j)),
            pl.BlockSpec((tf, E), lambda i, j: (j, 0)),
            pl.BlockSpec((1, E), lambda i, j: (0, 0)),
            pl.BlockSpec((1, E), lambda i, j: (0, 0)),
            pl.BlockSpec((1, E), lambda i, j: (0, 0)),
        ],
        out_specs=pl.BlockSpec((tm, E), lambda i, j: (i, 0)),
        scratch_shapes=[pltpu.VMEM((tm, E), jnp.float32)],
        compiler_params=pltpu.CompilerParams(
            dimension_semantics=("parallel", "arbitrary"),
            vmem_limit_bytes=VMEM_LIMIT),
    )(x, w1, b1.reshape(1, dff), w2, b2.reshape(1, E),
      gamma.reshape(1, E), beta.reshape(1, E))


def _attn_head_grid_kernel(*refs, scale, has_mask):
    """One (batch, head) grid step: lane-aligned (T, D)/(S, D) blocks."""
    q_ref, k_ref, v_ref = refs[0], refs[1], refs[2]
    mask_ref = refs[3] if has_mask else None
    o_ref = refs[-1]

    q = q_ref[0] * scale                                  # (T, D) bf16, scaled once
    s = jax.lax.dot_general(q, k_ref[0], (((1,), (1,)), ((), ())),
                            preferred_element_type=jnp.float32)
    if has_mask:
        s = s + mask_ref[...].astype(jnp.float32)
    s = s - jnp.max(s, axis=-1, keepdims=True)
    p = jnp.exp(s)
    p = p * pl.reciprocal(jnp.sum(p, axis=-1, keepdims=True), approx=True)
    o_ref[0] = jnp.dot(p.astype(jnp.bfloat16), v_ref[0],
                       preferred_element_type=jnp.float32).astype(o_ref.dtype)


def _attn_heads_kernel(*refs, nhead, D, scale, q_off, k_off, v_off,
                       has_mask, separate_kv):
    """Fallback (D not 128-aligned): one grid step per batch. Each head is
    Ref-sliced out of the fused QKV / KV block (no whole-block value load) and
    stored directly into its o_ref column range (no concat)."""
    i = 0
    q_ref = refs[i]; i += 1
    if separate_kv:
        kv_ref = refs[i]; i += 1
    else:
        kv_ref = q_ref
    # Mask load/cast hoisted out of the head loop.
    mask = refs[i][...].astype(jnp.float32) if has_mask else None
    o_ref = refs[-1]

    for h in range(nhead):
        qh = q_ref[0, :, q_off + h * D: q_off + (h + 1) * D] * scale   # (T, D) bf16
        kh = kv_ref[0, :, k_off + h * D: k_off + (h + 1) * D]          # (S, D) bf16
        vh = kv_ref[0, :, v_off + h * D: v_off + (h + 1) * D]          # (S, D) bf16
        # contract on last dims -> no explicit K transpose materialized
        s = jax.lax.dot_general(qh, kh, (((1,), (1,)), ((), ())),
                                preferred_element_type=jnp.float32)
        if has_mask:
            s = s + mask
        s = s - jnp.max(s, axis=-1, keepdims=True)
        p = jnp.exp(s)
        p = p * pl.reciprocal(jnp.sum(p, axis=-1, keepdims=True), approx=True)
        oh = jnp.dot(p.astype(jnp.bfloat16), vh,
                     preferred_element_type=jnp.float32)               # (T, D) f32
        o_ref[0, :, h * D:(h + 1) * D] = oh.astype(o_ref.dtype)


def attention(q_src, kv_src, mask, nhead, q_off, k_off, v_off, out_dim):
    """q_src: (B, T, Eq) bf16 fused projection; kv_src: (B, S, Ekv) bf16 or None for
    self-attention (K/V sliced from q_src). mask: (T, S) additive or None.
    Returns (B, T, out_dim) bf16."""
    # TODO(synk): flash-style online-softmax with (tq, tkv) tiles for long sequences;
    # with per-head blocks the working set here is already sequence-bounded per head.
    separate_kv = kv_src is not None
    kv = kv_src if separate_kv else q_src
    B, T, _ = q_src.shape
    S, Ekv = kv.shape[1], kv.shape[2]
    Eq = q_src.shape[2]
    D = out_dim // nhead
    scale = 1.0 / math.sqrt(D)
    has_mask = mask is not None
    mask_bf16 = mask.astype(jnp.bfloat16) if has_mask else None

    if D % 128 == 0:
        # Head grid axis: lane-aligned per-head blocks, per-head working set, and
        # parallel grid extent (B * nhead) for megacore even when B == 1.
        qb, kb, vb = q_off // D, k_off // D, v_off // D
        in_arrays = [q_src, kv, kv]
        in_specs = [
            pl.BlockSpec((1, T, D), lambda b, h: (b, 0, qb + h)),
            pl.BlockSpec((1, S, D), lambda b, h: (b, 0, kb + h)),
            pl.BlockSpec((1, S, D), lambda b, h: (b, 0, vb + h)),
        ]
        if has_mask:
            in_arrays.append(mask_bf16)
            in_specs.append(pl.BlockSpec((T, S), lambda b, h: (0, 0)))
        return pl.pallas_call(
            partial(_attn_head_grid_kernel, scale=scale, has_mask=has_mask),
            out_shape=jax.ShapeDtypeStruct((B, T, out_dim), jnp.bfloat16),
            grid=(B, nhead),
            in_specs=in_specs,
            out_specs=pl.BlockSpec((1, T, D), lambda b, h: (b, 0, h)),
            compiler_params=pltpu.CompilerParams(
                dimension_semantics=("parallel", "parallel"),
                vmem_limit_bytes=VMEM_LIMIT),
        )(*in_arrays)

    # Fallback for small head_dim (< 128): heads handled inside the kernel.
    in_arrays = [q_src]
    in_specs = [pl.BlockSpec((1, T, Eq), lambda b: (b, 0, 0))]
    if separate_kv:
        in_arrays.append(kv)
        in_specs.append(pl.BlockSpec((1, S, Ekv), lambda b: (b, 0, 0)))
    if has_mask:
        in_arrays.append(mask_bf16)
        in_specs.append(pl.BlockSpec((T, S), lambda b: (0, 0)))
    kernel = partial(_attn_heads_kernel, nhead=nhead, D=D, scale=scale,
                     q_off=q_off, k_off=k_off, v_off=v_off,
                     has_mask=has_mask, separate_kv=separate_kv)
    return pl.pallas_call(
        kernel,
        out_shape=jax.ShapeDtypeStruct((B, T, out_dim), jnp.bfloat16),
        grid=(B,),
        in_specs=in_specs,
        out_specs=pl.BlockSpec((1, T, out_dim), lambda b: (b, 0, 0)),
        compiler_params=pltpu.CompilerParams(
            dimension_semantics=("parallel",),
            vmem_limit_bytes=VMEM_LIMIT),
    )(*in_arrays)


def _ln_kernel(x_ref, g_ref, b_ref, o_ref, *, eps):
    y = x_ref[...].astype(jnp.float32)
    mu = jnp.mean(y, axis=-1, keepdims=True)
    yc = y - mu
    var = jnp.mean(yc * yc, axis=-1, keepdims=True)
    o_ref[...] = (yc * jax.lax.rsqrt(var + eps) * g_ref[...]
                  + b_ref[...]).astype(o_ref.dtype)


def layer_norm(x, gamma, beta, eps=1e-5):
    """Row-tiled LayerNorm over the last axis; bf16 in, f32 out (final norm)."""
    M, E = x.shape
    tm = _pick_block(M, LN_ROW_CAP, 8)
    return pl.pallas_call(
        partial(_ln_kernel, eps=eps),
        out_shape=jax.ShapeDtypeStruct((M, E), jnp.float32),
        grid=(M // tm,),
        in_specs=[
            pl.BlockSpec((tm, E), lambda i: (i, 0)),
            pl.BlockSpec((1, E), lambda i: (0, 0)),
            pl.BlockSpec((1, E), lambda i: (0, 0)),
        ],
        out_specs=pl.BlockSpec((tm, E), lambda i: (i, 0)),
        compiler_params=pltpu.CompilerParams(
            dimension_semantics=("parallel",),
            vmem_limit_bytes=VMEM_LIMIT),
    )(x, gamma.reshape(1, E), beta.reshape(1, E))


# --------------------------- Decoder composition -----------------------------

def decoder_layer(tgt, memory, tgt_mask, memory_mask, p, nhead):
    """tgt: (B, T, E) bf16, memory: (B, S, E) bf16 -> (B, T, E) bf16."""
    B, T, E = tgt.shape
    S = memory.shape[1]
    tgt_flat = tgt.reshape(B * T, E)

    # ---- self-attention block: fused QKV proj -> attention -> fused out-proj+add+LN
    qkv = linear(tgt_flat, p["sa_w_qkv"], p["sa_b_qkv"]).reshape(B, T, 3 * E)
    sa = attention(qkv, None, tgt_mask, nhead,
                   q_off=0, k_off=E, v_off=2 * E, out_dim=E)
    x = matmul_residual_layernorm(sa.reshape(B * T, E), p["sa_wo"], p["sa_bo"],
                                  tgt_flat, p["ln1_g"], p["ln1_b"])      # (B*T, E) bf16

    # ---- cross-attention block: q proj + fused KV proj -> attention -> fused epilogue
    q = linear(x, p["ca_wq"], p["ca_bq"]).reshape(B, T, E)
    kv = linear(memory.reshape(B * S, E), p["ca_w_kv"], p["ca_b_kv"]).reshape(B, S, 2 * E)
    ca = attention(q, kv, memory_mask, nhead,
                   q_off=0, k_off=0, v_off=E, out_dim=E)
    x2 = matmul_residual_layernorm(ca.reshape(B * T, E), p["ca_wo"], p["ca_bo"],
                                   x, p["ln2_g"], p["ln2_b"])            # (B*T, E) bf16

    # ---- fully fused feed-forward block (ReLU, PyTorch default)
    x3 = ffn_residual_layernorm(x2, p["w1"], p["b1"], p["w2"], p["b2"],
                                p["ln3_g"], p["ln3_b"])                  # (B*T, E) bf16
    return x3.reshape(B, T, E)


def transformer_decoder(tgt, memory, tgt_mask, memory_mask, layer_params,
                        final_norm, *, nhead):
    """memory_mask may be None (equivalent to an all-zero additive mask)."""
    output = tgt.astype(jnp.bfloat16)
    memory = memory.astype(jnp.bfloat16)
    for p in layer_params:
        output = decoder_layer(output, memory, tgt_mask, memory_mask, p, nhead)
    B, T, E = output.shape
    if final_norm is not None:
        output = layer_norm(output.reshape(B * T, E),
                            final_norm["g"], final_norm["b"]).reshape(B, T, E)
    else:
        output = output.astype(jnp.float32)
    return output


# ------------------------------ Parameter init --------------------------------

def init_layer_params(key, E, dff, nhead):
    ks = jax.random.split(key, 7)
    scale = 0.02

    def w(k, shape):  # weights stored bf16 (MXU inputs), f32 accumulation in-kernel
        return (scale * jax.random.normal(k, shape, jnp.float32)).astype(jnp.bfloat16)

    return {
        # self-attention: fused [Wq | Wk | Wv] -> (E, 3E)
        "sa_w_qkv": w(ks[0], (E, 3 * E)), "sa_b_qkv": jnp.zeros((3 * E,), jnp.float32),
        "sa_wo": w(ks[1], (E, E)), "sa_bo": jnp.zeros((E,), jnp.float32),
        # cross-attention: Wq (E,E), fused [Wk | Wv] -> (E, 2E)
        "ca_wq": w(ks[2], (E, E)), "ca_bq": jnp.zeros((E,), jnp.float32),
        "ca_w_kv": w(ks[3], (E, 2 * E)), "ca_b_kv": jnp.zeros((2 * E,), jnp.float32),
        "ca_wo": w(ks[4], (E, E)), "ca_bo": jnp.zeros((E,), jnp.float32),
        # feed-forward
        "w1": w(ks[5], (E, dff)), "b1": jnp.zeros((dff,), jnp.float32),
        "w2": w(ks[6], (dff, E)), "b2": jnp.zeros((E,), jnp.float32),
        # layer norms
        "ln1_g": jnp.ones((E,), jnp.float32), "ln1_b": jnp.zeros((E,), jnp.float32),
        "ln2_g": jnp.ones((E,), jnp.float32), "ln2_b": jnp.zeros((E,), jnp.float32),
        "ln3_g": jnp.ones((E,), jnp.float32), "ln3_b": jnp.zeros((E,), jnp.float32),
    }


# ------------------------------------ main -------------------------------------

if __name__ == "__main__":
    B, T, S, E = 2, 8, 8, 32          # batch, tgt len, memory len, embed dim
    nhead, dff, num_layers = 4, 64, 2

    root = jax.random.PRNGKey(0)
    k_tgt, k_mem, k_params = jax.random.split(root, 3)

    tgt = jax.random.normal(k_tgt, (B, T, E), jnp.float32)
    memory = jax.random.normal(k_mem, (B, S, E), jnp.float32)

    # causal additive tgt mask (T, T); memory mask is None (== all-zero mask)
    tgt_mask = jnp.triu(jnp.ones((T, T), jnp.float32), k=1) * (-1e9)
    memory_mask = None

    layer_keys = jax.random.split(k_params, num_layers)
    layer_params = [init_layer_params(layer_keys[i], E, dff, nhead)
                    for i in range(num_layers)]
    final_norm = {"g": jnp.ones((E,), jnp.float32),
                  "b": jnp.zeros((E,), jnp.float32)}

    fwd = jax.jit(partial(transformer_decoder, nhead=nhead))
    out = fwd(tgt, memory, tgt_mask, memory_mask, layer_params, final_norm)
    out = jax.block_until_ready(out)
    assert out.shape == (B, T, E)
    assert bool(jnp.all(jnp.isfinite(out)))
    print("KERNEL_OK")
</pallas_src>

<mosaic_0001>
module attributes {stable_mosaic.version = 11 : i64} {
  func.func @_linear_kernel(%arg0: i32, %arg1: i32, %arg2: i32, %arg3: memref<16x32xbf16, #tpu.memory_space<vmem>>, %arg4: memref<32x64xbf16, #tpu.memory_space<vmem>>, %arg5: memref<1x64xf32, #tpu.memory_space<vmem>>, %arg6: memref<16x64xbf16, #tpu.memory_space<vmem>>, %arg7: memref<16x64xf32, #tpu.memory_space<vmem>>) attributes {dimension_semantics = [#tpu.dimension_semantics<parallel>, #tpu.dimension_semantics<parallel>, #tpu.dimension_semantics<arbitrary>], iteration_bounds = array<i64: 1, 1, 1>, scalar_prefetch = 0 : i64, scratch_operands = 1 : i64, tpu.core_type = #tpu.core_type<tc>, window_params = [{transform_indices = @transform_0, window_bounds = array<i64: 16, 32>}, {transform_indices = @transform_1, window_bounds = array<i64: 32, 64>}, {transform_indices = @transform_2, window_bounds = array<i64: 1, 64>}, {transform_indices = @transform_3, window_bounds = array<i64: 16, 64>}]} {
    %c0_i32 = arith.constant 0 : i32
    %0 = arith.cmpi eq, %arg2, %c0_i32 : i32
    %1 = arith.extui %0 : i1 to i32
    %c0_i32_0 = arith.constant 0 : i32
    %2 = arith.cmpi ne, %1, %c0_i32_0 : i32
    scf.if %2 {
      %cst_10 = arith.constant 0.000000e+00 : f32
      %12 = vector.broadcast %cst_10 : f32 to vector<16x64xf32>
      %c0_11 = arith.constant 0 : index
      %c0_12 = arith.constant 0 : index
      %13 = vector.load %arg7[%c0_11, %c0_12] : memref<16x64xf32, #tpu.memory_space<vmem>>, vector<16x64xf32>
      tpu.vector_store %arg7[%c0_11, %c0_12], %12 {strides = array<i32>} : memref<16x64xf32, #tpu.memory_space<vmem>>, vector<16x64xf32>,
    } else {
    }
    %c0 = arith.constant 0 : index
    %c0_1 = arith.constant 0 : index
    %3 = vector.load %arg7[%c0, %c0_1] : memref<16x64xf32, #tpu.memory_space<vmem>>, vector<16x64xf32>
    %c0_2 = arith.constant 0 : index
    %c0_3 = arith.constant 0 : index
    %4 = vector.load %arg3[%c0_2, %c0_3] : memref<16x32xbf16, #tpu.memory_space<vmem>>, vector<16x32xbf16>
    %c0_4 = arith.constant 0 : index
    %c0_5 = arith.constant 0 : index
    %5 = vector.load %arg4[%c0_4, %c0_5] : memref<32x64xbf16, #tpu.memory_space<vmem>>, vector<32x64xbf16>
    %cst = arith.constant dense<0.000000e+00> : vector<16x64xf32>
    %6 = tpu.matmul %4, %5, %cst {dimension_numbers = #tpu.dot_dimension_numbers<[1], [0], [0], [1], [0, 0, 1, 1], [], []>} : vector<16x32xbf16>, vector<32x64xbf16>, vector<16x64xf32> -> vector<16x64xf32>
    %7 = arith.addf %3, %6 : vector<16x64xf32>
    %c0_6 = arith.constant 0 : index
    %c0_7 = arith.constant 0 : index
    %8 = vector.load %arg7[%c0_6, %c0_7] : memref<16x64xf32, #tpu.memory_space<vmem>>, vector<16x64xf32>
    tpu.vector_store %arg7[%c0_6, %c0_7], %7 {strides = array<i32>} : memref<16x64xf32, #tpu.memory_space<vmem>>, vector<16x64xf32>,
    %c0_i32_8 = arith.constant 0 : i32
    %9 = arith.cmpi eq, %arg2, %c0_i32_8 : i32
    %10 = arith.extui %9 : i1 to i32
    %c0_i32_9 = arith.constant 0 : i32
    %11 = arith.cmpi ne, %10, %c0_i32_9 : i32
    scf.if %11 {
      %c0_10 = arith.constant 0 : index
      %c0_11 = arith.constant 0 : index
      %12 = vector.load %arg7[%c0_10, %c0_11] : memref<16x64xf32, #tpu.memory_space<vmem>>, vector<16x64xf32>
      %c0_12 = arith.constant 0 : index
      %c0_13 = arith.constant 0 : index
      %13 = vector.load %arg5[%c0_12, %c0_13] : memref<1x64xf32, #tpu.memory_space<vmem>>, vector<1x64xf32>
      %14 = vector.broadcast %13 : vector<1x64xf32> to vector<16x64xf32>
      %15 = arith.addf %12, %14 : vector<16x64xf32>
      %16 = arith.truncf %15 : vector<16x64xf32> to vector<16x64xbf16>
      %c0_14 = arith.constant 0 : index
      %c0_15 = arith.constant 0 : index
      %17 = vector.load %arg6[%c0_14, %c0_15] : memref<16x64xbf16, #tpu.memory_space<vmem>>, vector<16x64xbf16>
      tpu.vector_store %arg6[%c0_14, %c0_15], %16 {strides = array<i32>} : memref<16x64xbf16, #tpu.memory_space<vmem>>, vector<16x64xbf16>,
    } else {
    }
    return
  }
  func.func @transform_0(%arg0: i32, %arg1: i32, %arg2: i32) -> (i32, i32) {
    %c0_i32 = arith.constant 0 : i32
    return %arg0, %arg2 : i32, i32
  }
  func.func @transform_1(%arg0: i32, %arg1: i32, %arg2: i32) -> (i32, i32) {
    %c0_i32 = arith.constant 0 : i32
    return %arg2, %arg1 : i32, i32
  }
  func.func @transform_2(%arg0: i32, %arg1: i32, %arg2: i32) -> (i32, i32) {
    %c0_i32 = arith.constant 0 : i32
    %c0_i32_0 = arith.constant 0 : i32
    return %c0_i32, %arg1 : i32, i32
  }
  func.func @transform_3(%arg0: i32, %arg1: i32, %arg2: i32) -> (i32, i32) {
    %c0_i32 = arith.constant 0 : i32
    return %arg0, %arg1 : i32, i32
  }
}

module attributes {stable_mosaic.version = 11 : i64} {
  func.func @_linear_kernel(%arg0: i32, %arg1: i32, %arg2: i32, %arg3: memref<16x32xbf16, #tpu.memory_space<vmem>>, %arg4: memref<32x96xbf16, #tpu.memory_space<vmem>>, %arg5: memref<1x96xf32, #tpu.memory_space<vmem>>, %arg6: memref<16x96xbf16, #tpu.memory_space<vmem>>, %arg7: memref<16x96xf32, #tpu.memory_space<vmem>>) attributes {dimension_semantics = [#tpu.dimension_semantics<parallel>, #tpu.dimension_semantics<parallel>, #tpu.dimension_semantics<arbitrary>], iteration_bounds = array<i64: 1, 1, 1>, scalar_prefetch = 0 : i64, scratch_operands = 1 : i64, tpu.core_type = #tpu.core_type<tc>, window_params = [{transform_indices = @transform_0, window_bounds = array<i64: 16, 32>}, {transform_indices = @transform_1, window_bounds = array<i64: 32, 96>}, {transform_indices = @transform_2, window_bounds = array<i64: 1, 96>}, {transform_indices = @transform_3, window_bounds = array<i64: 16, 96>}]} {
    %c0_i32 = arith.constant 0 : i32
    %0 = arith.cmpi eq, %arg2, %c0_i32 : i32
    %1 = arith.extui %0 : i1 to i32
    %c0_i32_0 = arith.constant 0 : i32
    %2 = arith.cmpi ne, %1, %c0_i32_0 : i32
    scf.if %2 {
      %cst_10 = arith.constant 0.000000e+00 : f32
      %12 = vector.broadcast %cst_10 : f32 to vector<16x96xf32>
      %c0_11 = arith.constant 0 : index
      %c0_12 = arith.constant 0 : index
      %13 = vector.load %arg7[%c0_11, %c0_12] : memref<16x96xf32, #tpu.memory_space<vmem>>, vector<16x96xf32>
      tpu.vector_store %arg7[%c0_11, %c0_12], %12 {strides = array<i32>} : memref<16x96xf32, #tpu.memory_space<vmem>>, vector<16x96xf32>,
    } else {
    }
    %c0 = arith.constant 0 : index
    %c0_1 = arith.constant 0 : index
    %3 = vector.load %arg7[%c0, %c0_1] : memref<16x96xf32, #tpu.memory_space<vmem>>, vector<16x96xf32>
    %c0_2 = arith.constant 0 : index
    %c0_3 = arith.constant 0 : index
    %4 = vector.load %arg3[%c0_2, %c0_3] : memref<16x32xbf16, #tpu.memory_space<vmem>>, vector<16x32xbf16>
    %c0_4 = arith.constant 0 : index
    %c0_5 = arith.constant 0 : index
    %5 = vector.load %arg4[%c0_4, %c0_5] : memref<32x96xbf16, #tpu.memory_space<vmem>>, vector<32x96xbf16>
    %cst = arith.constant dense<0.000000e+00> : vector<16x96xf32>
    %6 = tpu.matmul %4, %5, %cst {dimension_numbers = #tpu.dot_dimension_numbers<[1], [0], [0], [1], [0, 0, 1, 1], [], []>} : vector<16x32xbf16>, vector<32x96xbf16>, vector<16x96xf32> -> vector<16x96xf32>
    %7 = arith.addf %3, %6 : vector<16x96xf32>
    %c0_6 = arith.constant 0 : index
    %c0_7 = arith.constant 0 : index
    %8 = vector.load %arg7[%c0_6, %c0_7] : memref<16x96xf32, #tpu.memory_space<vmem>>, vector<16x96xf32>
    tpu.vector_store %arg7[%c0_6, %c0_7], %7 {strides = array<i32>} : memref<16x96xf32, #tpu.memory_space<vmem>>, vector<16x96xf32>,
    %c0_i32_8 = arith.constant 0 : i32
    %9 = arith.cmpi eq, %arg2, %c0_i32_8 : i32
    %10 = arith.extui %9 : i1 to i32
    %c0_i32_9 = arith.constant 0 : i32
    %11 = arith.cmpi ne, %10, %c0_i32_9 : i32
    scf.if %11 {
      %c0_10 = arith.constant 0 : index
      %c0_11 = arith.constant 0 : index
      %12 = vector.load %arg7[%c0_10, %c0_11] : memref<16x96xf32, #tpu.memory_space<vmem>>, vector<16x96xf32>
      %c0_12 = arith.constant 0 : index
      %c0_13 = arith.constant 0 : index
      %13 = vector.load %arg5[%c0_12, %c0_13] : memref<1x96xf32, #tpu.memory_space<vmem>>, vector<1x96xf32>
      %14 = vector.broadcast %13 : vector<1x96xf32> to vector<16x96xf32>
      %15 = arith.addf %12, %14 : vector<16x96xf32>
      %16 = arith.truncf %15 : vector<16x96xf32> to vector<16x96xbf16>
      %c0_14 = arith.constant 0 : index
      %c0_15 = arith.constant 0 : index
      %17 = vector.load %arg6[%c0_14, %c0_15] : memref<16x96xbf16, #tpu.memory_space<vmem>>, vector<16x96xbf16>
      tpu.vector_store %arg6[%c0_14, %c0_15], %16 {strides = array<i32>} : memref<16x96xbf16, #tpu.memory_space<vmem>>, vector<16x96xbf16>,
    } else {
    }
    return
  }
  func.func @transform_0(%arg0: i32, %arg1: i32, %arg2: i32) -> (i32, i32) {
    %c0_i32 = arith.constant 0 : i32
    return %arg0, %arg2 : i32, i32
  }
  func.func @transform_1(%arg0: i32, %arg1: i32, %arg2: i32) -> (i32, i32) {
    %c0_i32 = arith.constant 0 : i32
    return %arg2, %arg1 : i32, i32
  }
  func.func @transform_2(%arg0: i32, %arg1: i32, %arg2: i32) -> (i32, i32) {
    %c0_i32 = arith.constant 0 : i32
    %c0_i32_0 = arith.constant 0 : i32
    return %c0_i32, %arg1 : i32, i32
  }
  func.func @transform_3(%arg0: i32, %arg1: i32, %arg2: i32) -> (i32, i32) {
    %c0_i32 = arith.constant 0 : i32
    return %arg0, %arg1 : i32, i32
  }
}

module attributes {stable_mosaic.version = 11 : i64} {
  func.func @_matmul_res_ln_kernel(%arg0: i32, %arg1: i32, %arg2: memref<16x32xbf16, #tpu.memory_space<vmem>>, %arg3: memref<32x32xbf16, #tpu.memory_space<vmem>>, %arg4: memref<1x32xf32, #tpu.memory_space<vmem>>, %arg5: memref<16x32xbf16, #tpu.memory_space<vmem>>, %arg6: memref<1x32xf32, #tpu.memory_space<vmem>>, %arg7: memref<1x32xf32, #tpu.memory_space<vmem>>, %arg8: memref<16x32xbf16, #tpu.memory_space<vmem>>, %arg9: memref<16x32xf32, #tpu.memory_space<vmem>>) attributes {dimension_semantics = [#tpu.dimension_semantics<parallel>, #tpu.dimension_semantics<arbitrary>], iteration_bounds = array<i64: 1, 1>, scalar_prefetch = 0 : i64, scratch_operands = 1 : i64, tpu.core_type = #tpu.core_type<tc>, window_params = [{transform_indices = @transform_0, window_bounds = array<i64: 16, 32>}, {transform_indices = @transform_1, window_bounds = array<i64: 32, 32>}, {pipeline_mode = #tpu.pipeline_mode<synchronous>, transform_indices = @transform_2, window_bounds = array<i64: 1, 32>}, {transform_indices = @transform_3, window_bounds = array<i64: 16, 32>}, {pipeline_mode = #tpu.pipeline_mode<synchronous>, transform_indices = @transform_4, window_bounds = array<i64: 1, 32>}, {pipeline_mode = #tpu.pipeline_mode<synchronous>, transform_indices = @transform_5, window_bounds = array<i64: 1, 32>}, {transform_indices = @transform_6, window_bounds = array<i64: 16, 32>}]} {
    %c0_i32 = arith.constant 0 : i32
    %0 = arith.cmpi eq, %arg1, %c0_i32 : i32
    %1 = arith.extui %0 : i1 to i32
    %c0_i32_0 = arith.constant 0 : i32
    %2 = arith.cmpi ne, %1, %c0_i32_0 : i32
    scf.if %2 {
      %cst_10 = arith.constant 0.000000e+00 : f32
      %12 = vector.broadcast %cst_10 : f32 to vector<16x32xf32>
      %c0_11 = arith.constant 0 : index
      %c0_12 = arith.constant 0 : index
      %13 = vector.load %arg9[%c0_11, %c0_12] : memref<16x32xf32, #tpu.memory_space<vmem>>, vector<16x32xf32>
      tpu.vector_store %arg9[%c0_11, %c0_12], %12 {strides = array<i32>} : memref<16x32xf32, #tpu.memory_space<vmem>>, vector<16x32xf32>,
    } else {
    }
    %c0 = arith.constant 0 : index
    %c0_1 = arith.constant 0 : index
    %3 = vector.load %arg9[%c0, %c0_1] : memref<16x32xf32, #tpu.memory_space<vmem>>, vector<16x32xf32>
    %c0_2 = arith.constant 0 : index
    %c0_3 = arith.constant 0 : index
    %4 = vector.load %arg2[%c0_2, %c0_3] : memref<16x32xbf16, #tpu.memory_space<vmem>>, vector<16x32xbf16>
    %c0_4 = arith.constant 0 : index
    %c0_5 = arith.constant 0 : index
    %5 = vector.load %arg3[%c0_4, %c0_5] : memref<32x32xbf16, #tpu.memory_space<vmem>>, vector<32x32xbf16>
    %cst = arith.constant dense<0.000000e+00> : vector<16x32xf32>
    %6 = tpu.matmul %4, %5, %cst {dimension_numbers = #tpu.dot_dimension_numbers<[1], [0], [0], [1], [0, 0, 1, 1], [], []>} : vector<16x32xbf16>, vector<32x32xbf16>, vector<16x32xf32> -> vector<16x32xf32>
    %7 = arith.addf %3, %6 : vector<16x32xf32>
    %c0_6 = arith.constant 0 : index
    %c0_7 = arith.constant 0 : index
    %8 = vector.load %arg9[%c0_6, %c0_7] : memref<16x32xf32, #tpu.memory_space<vmem>>, vector<16x32xf32>
    tpu.vector_store %arg9[%c0_6, %c0_7], %7 {strides = array<i32>} : memref<16x32xf32, #tpu.memory_space<vmem>>, vector<16x32xf32>,
    %c0_i32_8 = arith.constant 0 : i32
    %9 = arith.cmpi eq, %arg1, %c0_i32_8 : i32
    %10 = arith.extui %9 : i1 to i32
    %c0_i32_9 = arith.constant 0 : i32
    %11 = arith.cmpi ne, %10, %c0_i32_9 : i32
    scf.if %11 {
      %c0_10 = arith.constant 0 : index
      %c0_11 = arith.constant 0 : index
      %12 = vector.load %arg9[%c0_10, %c0_11] : memref<16x32xf32, #tpu.memory_space<vmem>>, vector<16x32xf32>
      %c0_12 = arith.constant 0 : index
      %c0_13 = arith.constant 0 : index
      %13 = vector.load %arg4[%c0_12, %c0_13] : memref<1x32xf32, #tpu.memory_space<vmem>>, vector<1x32xf32>
      %14 = vector.broadcast %13 : vector<1x32xf32> to vector<16x32xf32>
      %15 = arith.addf %12, %14 : vector<16x32xf32>
      %c0_14 = arith.constant 0 : index
      %c0_15 = arith.constant 0 : index
      %16 = vector.load %arg5[%c0_14, %c0_15] : memref<16x32xbf16, #tpu.memory_space<vmem>>, vector<16x32xbf16>
      %17 = arith.extf %16 : vector<16x32xbf16> to vector<16x32xf32>
      %18 = arith.addf %15, %17 : vector<16x32xf32>
      %cst_16 = arith.constant dense<0.000000e+00> : vector<16xf32>
      %19 = vector.multi_reduction <add>, %18, %cst_16 [1] : vector<16x32xf32> to vector<16xf32>
      %20 = vector.shape_cast %19 : vector<16xf32> to vector<16x1xf32>
      %cst_17 = arith.constant 3.200000e+01 : f32
      %21 = vector.broadcast %cst_17 : f32 to vector<16x1xf32>
      %22 = arith.divf %20, %21 : vector<16x1xf32>
      %23 = vector.broadcast %22 : vector<16x1xf32> to vector<16x32xf32>
      %24 = arith.subf %18, %23 : vector<16x32xf32>
      %25 = arith.mulf %24, %24 : vector<16x32xf32>
      %cst_18 = arith.constant dense<0.000000e+00> : vector<16xf32>
      %26 = vector.multi_reduction <add>, %25, %cst_18 [1] : vector<16x32xf32> to vector<16xf32>
      %27 = vector.shape_cast %26 : vector<16xf32> to vector<16x1xf32>
      %cst_19 = arith.constant 3.200000e+01 : f32
      %28 = vector.broadcast %cst_19 : f32 to vector<16x1xf32>
      %29 = arith.divf %27, %28 : vector<16x1xf32>
      %cst_20 = arith.constant 9.99999974E-6 : f32
      %30 = vector.broadcast %cst_20 : f32 to vector<16x1xf32>
      %31 = arith.addf %29, %30 : vector<16x1xf32>
      %32 = math.rsqrt %31 : vector<16x1xf32>
      %33 = vector.broadcast %32 : vector<16x1xf32> to vector<16x32xf32>
      %34 = arith.mulf %24, %33 : vector<16x32xf32>
      %c0_21 = arith.constant 0 : index
      %c0_22 = arith.constant 0 : index
      %35 = vector.load %arg6[%c0_21, %c0_22] : memref<1x32xf32, #tpu.memory_space<vmem>>, vector<1x32xf32>
      %36 = vector.broadcast %35 : vector<1x32xf32> to vector<16x32xf32>
      %37 = arith.mulf %34, %36 : vector<16x32xf32>
      %c0_23 = arith.constant 0 : index
      %c0_24 = arith.constant 0 : index
      %38 = vector.load %arg7[%c0_23, %c0_24] : memref<1x32xf32, #tpu.memory_space<vmem>>, vector<1x32xf32>
      %39 = vector.broadcast %38 : vector<1x32xf32> to vector<16x32xf32>
      %40 = arith.addf %37, %39 : vector<16x32xf32>
      %41 = arith.truncf %40 : vector<16x32xf32> to vector<16x32xbf16>
      %c0_25 = arith.constant 0 : index
      %c0_26 = arith.constant 0 : index
      %42 = vector.load %arg8[%c0_25, %c0_26] : memref<16x32xbf16, #tpu.memory_space<vmem>>, vector<16x32xbf16>
      tpu.vector_store %arg8[%c0_25, %c0_26], %41 {strides = array<i32>} : memref<16x32xbf16, #tpu.memory_space<vmem>>, vector<16x32xbf16>,
    } else {
    }
    return
  }
  func.func @transform_0(%arg0: i32, %arg1: i32) -> (i32, i32) {
    %c0_i32 = arith.constant 0 : i32
    return %arg0, %arg1 : i32, i32
  }
  func.func @transform_1(%arg0: i32, %arg1: i32) -> (i32, i32) {
    %c0_i32 = arith.constant 0 : i32
    %c0_i32_0 = arith.constant 0 : i32
    return %arg1, %c0_i32 : i32, i32
  }
  func.func @transform_2(%arg0: i32, %arg1: i32) -> (i32, i32) {
    %c0_i32 = arith.constant 0 : i32
    %c0_i32_0 = arith.constant 0 : i32
    %c0_i32_1 = arith.constant 0 : i32
    return %c0_i32, %c0_i32_0 : i32, i32
  }
  func.func @transform_3(%arg0: i32, %arg1: i32) -> (i32, i32) {
    %c0_i32 = arith.constant 0 : i32
    %c0_i32_0 = arith.constant 0 : i32
    return %arg0, %c0_i32 : i32, i32
  }
  func.func @transform_4(%arg0: i32, %arg1: i32) -> (i32, i32) {
    %c0_i32 = arith.constant 0 : i32
    %c0_i32_0 = arith.constant 0 : i32
    %c0_i32_1 = arith.constant 0 : i32
    return %c0_i32, %c0_i32_0 : i32, i32
  }
  func.func @transform_5(%arg0: i32, %arg1: i32) -> (i32, i32) {
    %c0_i32 = arith.constant 0 : i32
    %c0_i32_0 = arith.constant 0 : i32
    %c0_i32_1 = arith.constant 0 : i32
    return %c0_i32, %c0_i32_0 : i32, i32
  }
  func.func @transform_6(%arg0: i32, %arg1: i32) -> (i32, i32) {
    %c0_i32 = arith.constant 0 : i32
    %c0_i32_0 = arith.constant 0 : i32
    return %arg0, %c0_i32 : i32, i32
  }
}

module attributes {stable_mosaic.version = 11 : i64} {
  func.func @_attn_heads_kernel(%arg0: i32, %arg1: memref<1x8x96xbf16, #tpu.memory_space<vmem>>, %arg2: memref<8x8xbf16, #tpu.memory_space<vmem>>, %arg3: memref<1x8x32xbf16, #tpu.memory_space<vmem>>) attributes {dimension_semantics = [#tpu.dimension_semantics<parallel>], iteration_bounds = array<i64: 2>, scalar_prefetch = 0 : i64, scratch_operands = 0 : i64, tpu.core_type = #tpu.core_type<tc>, window_params = [{transform_indices = @transform_0, window_bounds = array<i64: 1, 8, 96>}, {pipeline_mode = #tpu.pipeline_mode<synchronous>, transform_indices = @transform_1, window_bounds = array<i64: 8, 8>}, {transform_indices = @transform_2, window_bounds = array<i64: 1, 8, 32>}]} {
    %c0 = arith.constant 0 : index
    %c0_0 = arith.constant 0 : index
    %0 = vector.load %arg2[%c0, %c0_0] : memref<8x8xbf16, #tpu.memory_space<vmem>>, vector<8x8xbf16>
    %1 = arith.extf %0 : vector<8x8xbf16> to vector<8x8xf32>
    %c0_1 = arith.constant 0 : index
    %c0_2 = arith.constant 0 : index
    %c0_3 = arith.constant 0 : index
    %2 = vector.load %arg1[%c0_1, %c0_2, %c0_3] : memref<1x8x96xbf16, #tpu.memory_space<vmem>>, vector<1x8x8xbf16>
    %3 = vector.shape_cast %2 : vector<1x8x8xbf16> to vector<8x8xbf16>
    %cst = arith.constant 3.535160e-01 : bf16
    %4 = vector.broadcast %cst : bf16 to vector<8x8xbf16>
    %5 = arith.mulf %3, %4 : vector<8x8xbf16>
    %c0_4 = arith.constant 0 : index
    %c0_5 = arith.constant 0 : index
    %c32 = arith.constant 32 : index
    %6 = vector.load %arg1[%c0_4, %c0_5, %c32] : memref<1x8x96xbf16, #tpu.memory_space<vmem>>, vector<1x8x8xbf16>
    %7 = vector.shape_cast %6 : vector<1x8x8xbf16> to vector<8x8xbf16>
    %c0_6 = arith.constant 0 : index
    %c0_7 = arith.constant 0 : index
    %c64 = arith.constant 64 : index
    %8 = vector.load %arg1[%c0_6, %c0_7, %c64] : memref<1x8x96xbf16, #tpu.memory_space<vmem>>, vector<1x8x8xbf16>
    %9 = vector.shape_cast %8 : vector<1x8x8xbf16> to vector<8x8xbf16>
    %cst_8 = arith.constant dense<0.000000e+00> : vector<8x8xf32>
    %10 = tpu.matmul %5, %7, %cst_8 {dimension_numbers = #tpu.dot_dimension_numbers<[1], [1], [0], [0], [0, 0, 1, 0], [], []>} : vector<8x8xbf16>, vector<8x8xbf16>, vector<8x8xf32> -> vector<8x8xf32>
    %11 = arith.addf %10, %1 : vector<8x8xf32>
    %cst_9 = arith.constant dense<0xFF800000> : vector<8xf32>
    %12 = vector.multi_reduction <maximumf>, %11, %cst_9 [1] : vector<8x8xf32> to vector<8xf32>
    %13 = vector.shape_cast %12 : vector<8xf32> to vector<8x1xf32>
    %14 = vector.broadcast %13 : vector<8x1xf32> to vector<8x8xf32>
    %15 = arith.subf %11, %14 : vector<8x8xf32>
    %16 = math.exp %15 : vector<8x8xf32>
    %cst_10 = arith.constant dense<0.000000e+00> : vector<8xf32>
    %17 = vector.multi_reduction <add>, %16, %cst_10 [1] : vector<8x8xf32> to vector<8xf32>
    %18 = vector.shape_cast %17 : vector<8xf32> to vector<8x1xf32>
    %19 = tpu.reciprocal %18 {approx = true} : vector<8x1xf32> -> vector<8x1xf32>
    %20 = vector.broadcast %19 : vector<8x1xf32> to vector<8x8xf32>
    %21 = arith.mulf %16, %20 : vector<8x8xf32>
    %22 = arith.truncf %21 : vector<8x8xf32> to vector<8x8xbf16>
    %cst_11 = arith.constant dense<0.000000e+00> : vector<8x8xf32>
    %23 = tpu.matmul %22, %9, %cst_11 {dimension_numbers = #tpu.dot_dimension_numbers<[1], [0], [0], [1], [0, 0, 1, 1], [], []>} : vector<8x8xbf16>, vector<8x8xbf16>, vector<8x8xf32> -> vector<8x8xf32>
    %24 = arith.truncf %23 : vector<8x8xf32> to vector<8x8xbf16>
    %c0_12 = arith.constant 0 : index
    %c0_13 = arith.constant 0 : index
    %c0_14 = arith.constant 0 : index
    %25 = vector.load %arg3[%c0_12, %c0_13, %c0_14] : memref<1x8x32xbf16, #tpu.memory_space<vmem>>, vector<1x8x8xbf16>
    %26 = vector.shape_cast %25 : vector<1x8x8xbf16> to vector<8x8xbf16>
    %27 = vector.shape_cast %24 : vector<8x8xbf16> to vector<1x8x8xbf16>
    tpu.vector_store %arg3[%c0_12, %c0_13, %c0_14], %27 {strides = array<i32>} : memref<1x8x32xbf16, #tpu.memory_space<vmem>>, vector<1x8x8xbf16>,
    %c0_15 = arith.constant 0 : index
    %c0_16 = arith.constant 0 : index
    %c8 = arith.constant 8 : index
    %28 = vector.load %arg1[%c0_15, %c0_16, %c8] : memref<1x8x96xbf16, #tpu.memory_space<vmem>>, vector<1x8x8xbf16>
    %29 = vector.shape_cast %28 : vector<1x8x8xbf16> to vector<8x8xbf16>
    %cst_17 = arith.constant 3.535160e-01 : bf16
    %30 = vector.broadcast %cst_17 : bf16 to vector<8x8xbf16>
    %31 = arith.mulf %29, %30 : vector<8x8xbf16>
    %c0_18 = arith.constant 0 : index
    %c0_19 = arith.constant 0 : index
    %c40 = arith.constant 40 : index
    %32 = vector.load %arg1[%c0_18, %c0_19, %c40] : memref<1x8x96xbf16, #tpu.memory_space<vmem>>, vector<1x8x8xbf16>
    %33 = vector.shape_cast %32 : vector<1x8x8xbf16> to vector<8x8xbf16>
    %c0_20 = arith.constant 0 : index
    %c0_21 = arith.constant 0 : index
    %c72 = arith.constant 72 : index
    %34 = vector.load %arg1[%c0_20, %c0_21, %c72] : memref<1x8x96xbf16, #tpu.memory_space<vmem>>, vector<1x8x8xbf16>
    %35 = vector.shape_cast %34 : vector<1x8x8xbf16> to vector<8x8xbf16>
    %cst_22 = arith.constant dense<0.000000e+00> : vector<8x8xf32>
    %36 = tpu.matmul %31, %33, %cst_22 {dimension_numbers = #tpu.dot_dimension_numbers<[1], [1], [0], [0], [0, 0, 1, 0], [], []>} : vector<8x8xbf16>, vector<8x8xbf16>, vector<8x8xf32> -> vector<8x8xf32>
    %37 = arith.addf %36, %1 : vector<8x8xf32>
    %cst_23 = arith.constant dense<0xFF800000> : vector<8xf32>
    %38 = vector.multi_reduction <maximumf>, %37, %cst_23 [1] : vector<8x8xf32> to vector<8xf32>
    %39 = vector.shape_cast %38 : vector<8xf32> to vector<8x1xf32>
    %40 = vector.broadcast %39 : vector<8x1xf32> to vector<8x8xf32>
    %41 = arith.subf %37, %40 : vector<8x8xf32>
    %42 = math.exp %41 : vector<8x8xf32>
    %cst_24 = arith.constant dense<0.000000e+00> : vector<8xf32>
    %43 = vector.multi_reduction <add>, %42, %cst_24 [1] : vector<8x8xf32> to vector<8xf32>
    %44 = vector.shape_cast %43 : vector<8xf32> to vector<8x1xf32>
    %45 = tpu.reciprocal %44 {approx = true} : vector<8x1xf32> -> vector<8x1xf32>
    %46 = vector.broadcast %45 : vector<8x1xf32> to vector<8x8xf32>
    %47 = arith.mulf %42, %46 : vector<8x8xf32>
    %48 = arith.truncf %47 : vector<8x8xf32> to vector<8x8xbf16>
    %cst_25 = arith.constant dense<0.000000e+00> : vector<8x8xf32>
    %49 = tpu.matmul %48, %35, %cst_25 {dimension_numbers = #tpu.dot_dimension_numbers<[1], [0], [0], [1], [0, 0, 1, 1], [], []>} : vector<8x8xbf16>, vector<8x8xbf16>, vector<8x8xf32> -> vector<8x8xf32>
    %50 = arith.truncf %49 : vector<8x8xf32> to vector<8x8xbf16>
    %c0_26 = arith.constant 0 : index
    %c0_27 = arith.constant 0 : index
    %c8_28 = arith.constant 8 : index
    %51 = vector.load %arg3[%c0_26, %c0_27, %c8_28] : memref<1x8x32xbf16, #tpu.memory_space<vmem>>, vector<1x8x8xbf16>
    %52 = vector.shape_cast %51 : vector<1x8x8xbf16> to vector<8x8xbf16>
    %53 = vector.shape_cast %50 : vector<8x8xbf16> to vector<1x8x8xbf16>
    tpu.vector_store %arg3[%c0_26, %c0_27, %c8_28], %53 {strides = array<i32>} : memref<1x8x32xbf16, #tpu.memory_space<vmem>>, vector<1x8x8xbf16>,
    %c0_29 = arith.constant 0 : index
    %c0_30 = arith.constant 0 : index
    %c16 = arith.constant 16 : index
    %54 = vector.load %arg1[%c0_29, %c0_30, %c16] : memref<1x8x96xbf16, #tpu.memory_space<vmem>>, vector<1x8x8xbf16>
    %55 = vector.shape_cast %54 : vector<1x8x8xbf16> to vector<8x8xbf16>
    %cst_31 = arith.constant 3.535160e-01 : bf16
    %56 = vector.broadcast %cst_31 : bf16 to vector<8x8xbf16>
    %57 = arith.mulf %55, %56 : vector<8x8xbf16>
    %c0_32 = arith.constant 0 : index
    %c0_33 = arith.constant 0 : index
    %c48 = arith.constant 48 : index
    %58 = vector.load %arg1[%c0_32, %c0_33, %c48] : memref<1x8x96xbf16, #tpu.memory_space<vmem>>, vector<1x8x8xbf16>
    %59 = vector.shape_cast %58 : vector<1x8x8xbf16> to vector<8x8xbf16>
    %c0_34 = arith.constant 0 : index
    %c0_35 = arith.constant 0 : index
    %c80 = arith.constant 80 : index
    %60 = vector.load %arg1[%c0_34, %c0_35, %c80] : memref<1x8x96xbf16, #tpu.memory_space<vmem>>, vector<1x8x8xbf16>
    %61 = vector.shape_cast %60 : vector<1x8x8xbf16> to vector<8x8xbf16>
    %cst_36 = arith.constant dense<0.000000e+00> : vector<8x8xf32>
    %62 = tpu.matmul %57, %59, %cst_36 {dimension_numbers = #tpu.dot_dimension_numbers<[1], [1], [0], [0], [0, 0, 1, 0], [], []>} : vector<8x8xbf16>, vector<8x8xbf16>, vector<8x8xf32> -> vector<8x8xf32>
    %63 = arith.addf %62, %1 : vector<8x8xf32>
    %cst_37 = arith.constant dense<0xFF800000> : vector<8xf32>
    %64 = vector.multi_reduction <maximumf>, %63, %cst_37 [1] : vector<8x8xf32> to vector<8xf32>
    %65 = vector.shape_cast %64 : vector<8xf32> to vector<8x1xf32>
    %66 = vector.broadcast %65 : vector<8x1xf32> to vector<8x8xf32>
    %67 = arith.subf %63, %66 : vector<8x8xf32>
    %68 = math.exp %67 : vector<8x8xf32>
    %cst_38 = arith.constant dense<0.000000e+00> : vector<8xf32>
    %69 = vector.multi_reduction <add>, %68, %cst_38 [1] : vector<8x8xf32> to vector<8xf32>
    %70 = vector.shape_cast %69 : vector<8xf32> to vector<8x1xf32>
    %71 = tpu.reciprocal %70 {approx = true} : vector<8x1xf32> -> vector<8x1xf32>
    %72 = vector.broadcast %71 : vector<8x1xf32> to vector<8x8xf32>
    %73 = arith.mulf %68, %72 : vector<8x8xf32>
    %74 = arith.truncf %73 : vector<8x8xf32> to vector<8x8xbf16>
    %cst_39 = arith.constant dense<0.000000e+00> : vector<8x8xf32>
    %75 = tpu.matmul %74, %61, %cst_39 {dimension_numbers = #tpu.dot_dimension_numbers<[1], [0], [0], [1], [0, 0, 1, 1], [], []>} : vector<8x8xbf16>, vector<8x8xbf16>, vector<8x8xf32> -> vector<8x8xf32>
    %76 = arith.truncf %75 : vector<8x8xf32> to vector<8x8xbf16>
    %c0_40 = arith.constant 0 : index
    %c0_41 = arith.constant 0 : index
    %c16_42 = arith.constant 16 : index
    %77 = vector.load %arg3[%c0_40, %c0_41, %c16_42] : memref<1x8x32xbf16, #tpu.memory_space<vmem>>, vector<1x8x8xbf16>
    %78 = vector.shape_cast %77 : vector<1x8x8xbf16> to vector<8x8xbf16>
    %79 = vector.shape_cast %76 : vector<8x8xbf16> to vector<1x8x8xbf16>
    tpu.vector_store %arg3[%c0_40, %c0_41, %c16_42], %79 {strides = array<i32>} : memref<1x8x32xbf16, #tpu.memory_space<vmem>>, vector<1x8x8xbf16>,
    %c0_43 = arith.constant 0 : index
    %c0_44 = arith.constant 0 : index
    %c24 = arith.constant 24 : index
    %80 = vector.load %arg1[%c0_43, %c0_44, %c24] : memref<1x8x96xbf16, #tpu.memory_space<vmem>>, vector<1x8x8xbf16>
    %81 = vector.shape_cast %80 : vector<1x8x8xbf16> to vector<8x8xbf16>
    %cst_45 = arith.constant 3.535160e-01 : bf16
    %82 = vector.broadcast %cst_45 : bf16 to vector<8x8xbf16>
    %83 = arith.mulf %81, %82 : vector<8x8xbf16>
    %c0_46 = arith.constant 0 : index
    %c0_47 = arith.constant 0 : index
    %c56 = arith.constant 56 : index
    %84 = vector.load %arg1[%c0_46, %c0_47, %c56] : memref<1x8x96xbf16, #tpu.memory_space<vmem>>, vector<1x8x8xbf16>
    %85 = vector.shape_cast %84 : vector<1x8x8xbf16> to vector<8x8xbf16>
    %c0_48 = arith.constant 0 : index
    %c0_49 = arith.constant 0 : index
    %c88 = arith.constant 88 : index
    %86 = vector.load %arg1[%c0_48, %c0_49, %c88] : memref<1x8x96xbf16, #tpu.memory_space<vmem>>, vector<1x8x8xbf16>
    %87 = vector.shape_cast %86 : vector<1x8x8xbf16> to vector<8x8xbf16>
    %cst_50 = arith.constant dense<0.000000e+00> : vector<8x8xf32>
    %88 = tpu.matmul %83, %85, %cst_50 {dimension_numbers = #tpu.dot_dimension_numbers<[1], [1], [0], [0], [0, 0, 1, 0], [], []>} : vector<8x8xbf16>, vector<8x8xbf16>, vector<8x8xf32> -> vector<8x8xf32>
    %89 = arith.addf %88, %1 : vector<8x8xf32>
    %cst_51 = arith.constant dense<0xFF800000> : vector<8xf32>
    %90 = vector.multi_reduction <maximumf>, %89, %cst_51 [1] : vector<8x8xf32> to vector<8xf32>
    %91 = vector.shape_cast %90 : vector<8xf32> to vector<8x1xf32>
    %92 = vector.broadcast %91 : vector<8x1xf32> to vector<8x8xf32>
    %93 = arith.subf %89, %92 : vector<8x8xf32>
    %94 = math.exp %93 : vector<8x8xf32>
    %cst_52 = arith.constant dense<0.000000e+00> : vector<8xf32>
    %95 = vector.multi_reduction <add>, %94, %cst_52 [1] : vector<8x8xf32> to vector<8xf32>
    %96 = vector.shape_cast %95 : vector<8xf32> to vector<8x1xf32>
    %97 = tpu.reciprocal %96 {approx = true} : vector<8x1xf32> -> vector<8x1xf32>
    %98 = vector.broadcast %97 : vector<8x1xf32> to vector<8x8xf32>
    %99 = arith.mulf %94, %98 : vector<8x8xf32>
    %100 = arith.truncf %99 : vector<8x8xf32> to vector<8x8xbf16>
    %cst_53 = arith.constant dense<0.000000e+00> : vector<8x8xf32>
    %101 = tpu.matmul %100, %87, %cst_53 {dimension_numbers = #tpu.dot_dimension_numbers<[1], [0], [0], [1], [0, 0, 1, 1], [], []>} : vector<8x8xbf16>, vector<8x8xbf16>, vector<8x8xf32> -> vector<8x8xf32>
    %102 = arith.truncf %101 : vector<8x8xf32> to vector<8x8xbf16>
    %c0_54 = arith.constant 0 : index
    %c0_55 = arith.constant 0 : index
    %c24_56 = arith.constant 24 : index
    %103 = vector.load %arg3[%c0_54, %c0_55, %c24_56] : memref<1x8x32xbf16, #tpu.memory_space<vmem>>, vector<1x8x8xbf16>
    %104 = vector.shape_cast %103 : vector<1x8x8xbf16> to vector<8x8xbf16>
    %105 = vector.shape_cast %102 : vector<8x8xbf16> to vector<1x8x8xbf16>
    tpu.vector_store %arg3[%c0_54, %c0_55, %c24_56], %105 {strides = array<i32>} : memref<1x8x32xbf16, #tpu.memory_space<vmem>>, vector<1x8x8xbf16>,
    return
  }
  func.func @transform_0(%arg0: i32) -> (i32, i32, i32) {
    %c0_i32 = arith.constant 0 : i32
    %c0_i32_0 = arith.constant 0 : i32
    %c0_i32_1 = arith.constant 0 : i32
    return %arg0, %c0_i32, %c0_i32_0 : i32, i32, i32
  }
  func.func @transform_1(%arg0: i32) -> (i32, i32) {
    %c0_i32 = arith.constant 0 : i32
    %c0_i32_0 = arith.constant 0 : i32
    %c0_i32_1 = arith.constant 0 : i32
    return %c0_i32, %c0_i32_0 : i32, i32
  }
  func.func @transform_2(%arg0: i32) -> (i32, i32, i32) {
    %c0_i32 = arith.constant 0 : i32
    %c0_i32_0 = arith.constant 0 : i32
    %c0_i32_1 = arith.constant 0 : i32
    return %arg0, %c0_i32, %c0_i32_0 : i32, i32, i32
  }
}

module attributes {stable_mosaic.version = 11 : i64} {
  func.func @_linear_kernel(%arg0: i32, %arg1: i32, %arg2: i32, %arg3: memref<16x32xbf16, #tpu.memory_space<vmem>>, %arg4: memref<32x32xbf16, #tpu.memory_space<vmem>>, %arg5: memref<1x32xf32, #tpu.memory_space<vmem>>, %arg6: memref<16x32xbf16, #tpu.memory_space<vmem>>, %arg7: memref<16x32xf32, #tpu.memory_space<vmem>>) attributes {dimension_semantics = [#tpu.dimension_semantics<parallel>, #tpu.dimension_semantics<parallel>, #tpu.dimension_semantics<arbitrary>], iteration_bounds = array<i64: 1, 1, 1>, scalar_prefetch = 0 : i64, scratch_operands = 1 : i64, tpu.core_type = #tpu.core_type<tc>, window_params = [{transform_indices = @transform_0, window_bounds = array<i64: 16, 32>}, {transform_indices = @transform_1, window_bounds = array<i64: 32, 32>}, {transform_indices = @transform_2, window_bounds = array<i64: 1, 32>}, {transform_indices = @transform_3, window_bounds = array<i64: 16, 32>}]} {
    %c0_i32 = arith.constant 0 : i32
    %0 = arith.cmpi eq, %arg2, %c0_i32 : i32
    %1 = arith.extui %0 : i1 to i32
    %c0_i32_0 = arith.constant 0 : i32
    %2 = arith.cmpi ne, %1, %c0_i32_0 : i32
    scf.if %2 {
      %cst_10 = arith.constant 0.000000e+00 : f32
      %12 = vector.broadcast %cst_10 : f32 to vector<16x32xf32>
      %c0_11 = arith.constant 0 : index
      %c0_12 = arith.constant 0 : index
      %13 = vector.load %arg7[%c0_11, %c0_12] : memref<16x32xf32, #tpu.memory_space<vmem>>, vector<16x32xf32>
      tpu.vector_store %arg7[%c0_11, %c0_12], %12 {strides = array<i32>} : memref<16x32xf32, #tpu.memory_space<vmem>>, vector<16x32xf32>,
    } else {
    }
    %c0 = arith.constant 0 : index
    %c0_1 = arith.constant 0 : index
    %3 = vector.load %arg7[%c0, %c0_1] : memref<16x32xf32, #tpu.memory_space<vmem>>, vector<16x32xf32>
    %c0_2 = arith.constant 0 : index
    %c0_3 = arith.constant 0 : index
    %4 = vector.load %arg3[%c0_2, %c0_3] : memref<16x32xbf16, #tpu.memory_space<vmem>>, vector<16x32xbf16>
    %c0_4 = arith.constant 0 : index
    %c0_5 = arith.constant 0 : index
    %5 = vector.load %arg4[%c0_4, %c0_5] : memref<32x32xbf16, #tpu.memory_space<vmem>>, vector<32x32xbf16>
    %cst = arith.constant dense<0.000000e+00> : vector<16x32xf32>
    %6 = tpu.matmul %4, %5, %cst {dimension_numbers = #tpu.dot_dimension_numbers<[1], [0], [0], [1], [0, 0, 1, 1], [], []>} : vector<16x32xbf16>, vector<32x32xbf16>, vector<16x32xf32> -> vector<16x32xf32>
    %7 = arith.addf %3, %6 : vector<16x32xf32>
    %c0_6 = arith.constant 0 : index
    %c0_7 = arith.constant 0 : index
    %8 = vector.load %arg7[%c0_6, %c0_7] : memref<16x32xf32, #tpu.memory_space<vmem>>, vector<16x32xf32>
    tpu.vector_store %arg7[%c0_6, %c0_7], %7 {strides = array<i32>} : memref<16x32xf32, #tpu.memory_space<vmem>>, vector<16x32xf32>,
    %c0_i32_8 = arith.constant 0 : i32
    %9 = arith.cmpi eq, %arg2, %c0_i32_8 : i32
    %10 = arith.extui %9 : i1 to i32
    %c0_i32_9 = arith.constant 0 : i32
    %11 = arith.cmpi ne, %10, %c0_i32_9 : i32
    scf.if %11 {
      %c0_10 = arith.constant 0 : index
      %c0_11 = arith.constant 0 : index
      %12 = vector.load %arg7[%c0_10, %c0_11] : memref<16x32xf32, #tpu.memory_space<vmem>>, vector<16x32xf32>
      %c0_12 = arith.constant 0 : index
      %c0_13 = arith.constant 0 : index
      %13 = vector.load %arg5[%c0_12, %c0_13] : memref<1x32xf32, #tpu.memory_space<vmem>>, vector<1x32xf32>
      %14 = vector.broadcast %13 : vector<1x32xf32> to vector<16x32xf32>
      %15 = arith.addf %12, %14 : vector<16x32xf32>
      %16 = arith.truncf %15 : vector<16x32xf32> to vector<16x32xbf16>
      %c0_14 = arith.constant 0 : index
      %c0_15 = arith.constant 0 : index
      %17 = vector.load %arg6[%c0_14, %c0_15] : memref<16x32xbf16, #tpu.memory_space<vmem>>, vector<16x32xbf16>
      tpu.vector_store %arg6[%c0_14, %c0_15], %16 {strides = array<i32>} : memref<16x32xbf16, #tpu.memory_space<vmem>>, vector<16x32xbf16>,
    } else {
    }
    return
  }
  func.func @transform_0(%arg0: i32, %arg1: i32, %arg2: i32) -> (i32, i32) {
    %c0_i32 = arith.constant 0 : i32
    return %arg0, %arg2 : i32, i32
  }
  func.func @transform_1(%arg0: i32, %arg1: i32, %arg2: i32) -> (i32, i32) {
    %c0_i32 = arith.constant 0 : i32
    return %arg2, %arg1 : i32, i32
  }
  func.func @transform_2(%arg0: i32, %arg1: i32, %arg2: i32) -> (i32, i32) {
    %c0_i32 = arith.constant 0 : i32
    %c0_i32_0 = arith.constant 0 : i32
    return %c0_i32, %arg1 : i32, i32
  }
  func.func @transform_3(%arg0: i32, %arg1: i32, %arg2: i32) -> (i32, i32) {
    %c0_i32 = arith.constant 0 : i32
    return %arg0, %arg1 : i32, i32
  }
}

module attributes {stable_mosaic.version = 11 : i64} {
  func.func @_attn_heads_kernel(%arg0: i32, %arg1: memref<1x8x32xbf16, #tpu.memory_space<vmem>>, %arg2: memref<1x8x64xbf16, #tpu.memory_space<vmem>>, %arg3: memref<1x8x32xbf16, #tpu.memory_space<vmem>>) attributes {dimension_semantics = [#tpu.dimension_semantics<parallel>], iteration_bounds = array<i64: 2>, scalar_prefetch = 0 : i64, scratch_operands = 0 : i64, tpu.core_type = #tpu.core_type<tc>, window_params = [{transform_indices = @transform_0, window_bounds = array<i64: 1, 8, 32>}, {transform_indices = @transform_1, window_bounds = array<i64: 1, 8, 64>}, {transform_indices = @transform_2, window_bounds = array<i64: 1, 8, 32>}]} {
    %c0 = arith.constant 0 : index
    %c0_0 = arith.constant 0 : index
    %c0_1 = arith.constant 0 : index
    %0 = vector.load %arg1[%c0, %c0_0, %c0_1] : memref<1x8x32xbf16, #tpu.memory_space<vmem>>, vector<1x8x8xbf16>
    %1 = vector.shape_cast %0 : vector<1x8x8xbf16> to vector<8x8xbf16>
    %cst = arith.constant 3.535160e-01 : bf16
    %2 = vector.broadcast %cst : bf16 to vector<8x8xbf16>
    %3 = arith.mulf %1, %2 : vector<8x8xbf16>
    %c0_2 = arith.constant 0 : index
    %c0_3 = arith.constant 0 : index
    %c0_4 = arith.constant 0 : index
    %4 = vector.load %arg2[%c0_2, %c0_3, %c0_4] : memref<1x8x64xbf16, #tpu.memory_space<vmem>>, vector<1x8x8xbf16>
    %5 = vector.shape_cast %4 : vector<1x8x8xbf16> to vector<8x8xbf16>
    %c0_5 = arith.constant 0 : index
    %c0_6 = arith.constant 0 : index
    %c32 = arith.constant 32 : index
    %6 = vector.load %arg2[%c0_5, %c0_6, %c32] : memref<1x8x64xbf16, #tpu.memory_space<vmem>>, vector<1x8x8xbf16>
    %7 = vector.shape_cast %6 : vector<1x8x8xbf16> to vector<8x8xbf16>
    %cst_7 = arith.constant dense<0.000000e+00> : vector<8x8xf32>
    %8 = tpu.matmul %3, %5, %cst_7 {dimension_numbers = #tpu.dot_dimension_numbers<[1], [1], [0], [0], [0, 0, 1, 0], [], []>} : vector<8x8xbf16>, vector<8x8xbf16>, vector<8x8xf32> -> vector<8x8xf32>
    %cst_8 = arith.constant dense<0xFF800000> : vector<8xf32>
    %9 = vector.multi_reduction <maximumf>, %8, %cst_8 [1] : vector<8x8xf32> to vector<8xf32>
    %10 = vector.shape_cast %9 : vector<8xf32> to vector<8x1xf32>
    %11 = vector.broadcast %10 : vector<8x1xf32> to vector<8x8xf32>
    %12 = arith.subf %8, %11 : vector<8x8xf32>
    %13 = math.exp %12 : vector<8x8xf32>
    %cst_9 = arith.constant dense<0.000000e+00> : vector<8xf32>
    %14 = vector.multi_reduction <add>, %13, %cst_9 [1] : vector<8x8xf32> to vector<8xf32>
    %15 = vector.shape_cast %14 : vector<8xf32> to vector<8x1xf32>
    %16 = tpu.reciprocal %15 {approx = true} : vector<8x1xf32> -> vector<8x1xf32>
    %17 = vector.broadcast %16 : vector<8x1xf32> to vector<8x8xf32>
    %18 = arith.mulf %13, %17 : vector<8x8xf32>
    %19 = arith.truncf %18 : vector<8x8xf32> to vector<8x8xbf16>
    %cst_10 = arith.constant dense<0.000000e+00> : vector<8x8xf32>
    %20 = tpu.matmul %19, %7, %cst_10 {dimension_numbers = #tpu.dot_dimension_numbers<[1], [0], [0], [1], [0, 0, 1, 1], [], []>} : vector<8x8xbf16>, vector<8x8xbf16>, vector<8x8xf32> -> vector<8x8xf32>
    %21 = arith.truncf %20 : vector<8x8xf32> to vector<8x8xbf16>
    %c0_11 = arith.constant 0 : index
    %c0_12 = arith.constant 0 : index
    %c0_13 = arith.constant 0 : index
    %22 = vector.load %arg3[%c0_11, %c0_12, %c0_13] : memref<1x8x32xbf16, #tpu.memory_space<vmem>>, vector<1x8x8xbf16>
    %23 = vector.shape_cast %22 : vector<1x8x8xbf16> to vector<8x8xbf16>
    %24 = vector.shape_cast %21 : vector<8x8xbf16> to vector<1x8x8xbf16>
    tpu.vector_store %arg3[%c0_11, %c0_12, %c0_13], %24 {strides = array<i32>} : memref<1x8x32xbf16, #tpu.memory_space<vmem>>, vector<1x8x8xbf16>,
    %c0_14 = arith.constant 0 : index
    %c0_15 = arith.constant 0 : index
    %c8 = arith.constant 8 : index
    %25 = vector.load %arg1[%c0_14, %c0_15, %c8] : memref<1x8x32xbf16, #tpu.memory_space<vmem>>, vector<1x8x8xbf16>
    %26 = vector.shape_cast %25 : vector<1x8x8xbf16> to vector<8x8xbf16>
    %cst_16 = arith.constant 3.535160e-01 : bf16
    %27 = vector.broadcast %cst_16 : bf16 to vector<8x8xbf16>
    %28 = arith.mulf %26, %27 : vector<8x8xbf16>
    %c0_17 = arith.constant 0 : index
    %c0_18 = arith.constant 0 : index
    %c8_19 = arith.constant 8 : index
    %29 = vector.load %arg2[%c0_17, %c0_18, %c8_19] : memref<1x8x64xbf16, #tpu.memory_space<vmem>>, vector<1x8x8xbf16>
    %30 = vector.shape_cast %29 : vector<1x8x8xbf16> to vector<8x8xbf16>
    %c0_20 = arith.constant 0 : index
    %c0_21 = arith.constant 0 : index
    %c40 = arith.constant 40 : index
    %31 = vector.load %arg2[%c0_20, %c0_21, %c40] : memref<1x8x64xbf16, #tpu.memory_space<vmem>>, vector<1x8x8xbf16>
    %32 = vector.shape_cast %31 : vector<1x8x8xbf16> to vector<8x8xbf16>
    %cst_22 = arith.constant dense<0.000000e+00> : vector<8x8xf32>
    %33 = tpu.matmul %28, %30, %cst_22 {dimension_numbers = #tpu.dot_dimension_numbers<[1], [1], [0], [0], [0, 0, 1, 0], [], []>} : vector<8x8xbf16>, vector<8x8xbf16>, vector<8x8xf32> -> vector<8x8xf32>
    %cst_23 = arith.constant dense<0xFF800000> : vector<8xf32>
    %34 = vector.multi_reduction <maximumf>, %33, %cst_23 [1] : vector<8x8xf32> to vector<8xf32>
    %35 = vector.shape_cast %34 : vector<8xf32> to vector<8x1xf32>
    %36 = vector.broadcast %35 : vector<8x1xf32> to vector<8x8xf32>
    %37 = arith.subf %33, %36 : vector<8x8xf32>
    %38 = math.exp %37 : vector<8x8xf32>
    %cst_24 = arith.constant dense<0.000000e+00> : vector<8xf32>
    %39 = vector.multi_reduction <add>, %38, %cst_24 [1] : vector<8x8xf32> to vector<8xf32>
    %40 = vector.shape_cast %39 : vector<8xf32> to vector<8x1xf32>
    %41 = tpu.reciprocal %40 {approx = true} : vector<8x1xf32> -> vector<8x1xf32>
    %42 = vector.broadcast %41 : vector<8x1xf32> to vector<8x8xf32>
    %43 = arith.mulf %38, %42 : vector<8x8xf32>
    %44 = arith.truncf %43 : vector<8x8xf32> to vector<8x8xbf16>
    %cst_25 = arith.constant dense<0.000000e+00> : vector<8x8xf32>
    %45 = tpu.matmul %44, %32, %cst_25 {dimension_numbers = #tpu.dot_dimension_numbers<[1], [0], [0], [1], [0, 0, 1, 1], [], []>} : vector<8x8xbf16>, vector<8x8xbf16>, vector<8x8xf32> -> vector<8x8xf32>
    %46 = arith.truncf %45 : vector<8x8xf32> to vector<8x8xbf16>
    %c0_26 = arith.constant 0 : index
    %c0_27 = arith.constant 0 : index
    %c8_28 = arith.constant 8 : index
    %47 = vector.load %arg3[%c0_26, %c0_27, %c8_28] : memref<1x8x32xbf16, #tpu.memory_space<vmem>>, vector<1x8x8xbf16>
    %48 = vector.shape_cast %47 : vector<1x8x8xbf16> to vector<8x8xbf16>
    %49 = vector.shape_cast %46 : vector<8x8xbf16> to vector<1x8x8xbf16>
    tpu.vector_store %arg3[%c0_26, %c0_27, %c8_28], %49 {strides = array<i32>} : memref<1x8x32xbf16, #tpu.memory_space<vmem>>, vector<1x8x8xbf16>,
    %c0_29 = arith.constant 0 : index
    %c0_30 = arith.constant 0 : index
    %c16 = arith.constant 16 : index
    %50 = vector.load %arg1[%c0_29, %c0_30, %c16] : memref<1x8x32xbf16, #tpu.memory_space<vmem>>, vector<1x8x8xbf16>
    %51 = vector.shape_cast %50 : vector<1x8x8xbf16> to vector<8x8xbf16>
    %cst_31 = arith.constant 3.535160e-01 : bf16
    %52 = vector.broadcast %cst_31 : bf16 to vector<8x8xbf16>
    %53 = arith.mulf %51, %52 : vector<8x8xbf16>
    %c0_32 = arith.constant 0 : index
    %c0_33 = arith.constant 0 : index
    %c16_34 = arith.constant 16 : index
    %54 = vector.load %arg2[%c0_32, %c0_33, %c16_34] : memref<1x8x64xbf16, #tpu.memory_space<vmem>>, vector<1x8x8xbf16>
    %55 = vector.shape_cast %54 : vector<1x8x8xbf16> to vector<8x8xbf16>
    %c0_35 = arith.constant 0 : index
    %c0_36 = arith.constant 0 : index
    %c48 = arith.constant 48 : index
    %56 = vector.load %arg2[%c0_35, %c0_36, %c48] : memref<1x8x64xbf16, #tpu.memory_space<vmem>>, vector<1x8x8xbf16>
    %57 = vector.shape_cast %56 : vector<1x8x8xbf16> to vector<8x8xbf16>
    %cst_37 = arith.constant dense<0.000000e+00> : vector<8x8xf32>
    %58 = tpu.matmul %53, %55, %cst_37 {dimension_numbers = #tpu.dot_dimension_numbers<[1], [1], [0], [0], [0, 0, 1, 0], [], []>} : vector<8x8xbf16>, vector<8x8xbf16>, vector<8x8xf32> -> vector<8x8xf32>
    %cst_38 = arith.constant dense<0xFF800000> : vector<8xf32>
    %59 = vector.multi_reduction <maximumf>, %58, %cst_38 [1] : vector<8x8xf32> to vector<8xf32>
    %60 = vector.shape_cast %59 : vector<8xf32> to vector<8x1xf32>
    %61 = vector.broadcast %60 : vector<8x1xf32> to vector<8x8xf32>
    %62 = arith.subf %58, %61 : vector<8x8xf32>
    %63 = math.exp %62 : vector<8x8xf32>
    %cst_39 = arith.constant dense<0.000000e+00> : vector<8xf32>
    %64 = vector.multi_reduction <add>, %63, %cst_39 [1] : vector<8x8xf32> to vector<8xf32>
    %65 = vector.shape_cast %64 : vector<8xf32> to vector<8x1xf32>
    %66 = tpu.reciprocal %65 {approx = true} : vector<8x1xf32> -> vector<8x1xf32>
    %67 = vector.broadcast %66 : vector<8x1xf32> to vector<8x8xf32>
    %68 = arith.mulf %63, %67 : vector<8x8xf32>
    %69 = arith.truncf %68 : vector<8x8xf32> to vector<8x8xbf16>
    %cst_40 = arith.constant dense<0.000000e+00> : vector<8x8xf32>
    %70 = tpu.matmul %69, %57, %cst_40 {dimension_numbers = #tpu.dot_dimension_numbers<[1], [0], [0], [1], [0, 0, 1, 1], [], []>} : vector<8x8xbf16>, vector<8x8xbf16>, vector<8x8xf32> -> vector<8x8xf32>
    %71 = arith.truncf %70 : vector<8x8xf32> to vector<8x8xbf16>
    %c0_41 = arith.constant 0 : index
    %c0_42 = arith.constant 0 : index
    %c16_43 = arith.constant 16 : index
    %72 = vector.load %arg3[%c0_41, %c0_42, %c16_43] : memref<1x8x32xbf16, #tpu.memory_space<vmem>>, vector<1x8x8xbf16>
    %73 = vector.shape_cast %72 : vector<1x8x8xbf16> to vector<8x8xbf16>
    %74 = vector.shape_cast %71 : vector<8x8xbf16> to vector<1x8x8xbf16>
    tpu.vector_store %arg3[%c0_41, %c0_42, %c16_43], %74 {strides = array<i32>} : memref<1x8x32xbf16, #tpu.memory_space<vmem>>, vector<1x8x8xbf16>,
    %c0_44 = arith.constant 0 : index
    %c0_45 = arith.constant 0 : index
    %c24 = arith.constant 24 : index
    %75 = vector.load %arg1[%c0_44, %c0_45, %c24] : memref<1x8x32xbf16, #tpu.memory_space<vmem>>, vector<1x8x8xbf16>
    %76 = vector.shape_cast %75 : vector<1x8x8xbf16> to vector<8x8xbf16>
    %cst_46 = arith.constant 3.535160e-01 : bf16
    %77 = vector.broadcast %cst_46 : bf16 to vector<8x8xbf16>
    %78 = arith.mulf %76, %77 : vector<8x8xbf16>
    %c0_47 = arith.constant 0 : index
    %c0_48 = arith.constant 0 : index
    %c24_49 = arith.constant 24 : index
    %79 = vector.load %arg2[%c0_47, %c0_48, %c24_49] : memref<1x8x64xbf16, #tpu.memory_space<vmem>>, vector<1x8x8xbf16>
    %80 = vector.shape_cast %79 : vector<1x8x8xbf16> to vector<8x8xbf16>
    %c0_50 = arith.constant 0 : index
    %c0_51 = arith.constant 0 : index
    %c56 = arith.constant 56 : index
    %81 = vector.load %arg2[%c0_50, %c0_51, %c56] : memref<1x8x64xbf16, #tpu.memory_space<vmem>>, vector<1x8x8xbf16>
    %82 = vector.shape_cast %81 : vector<1x8x8xbf16> to vector<8x8xbf16>
    %cst_52 = arith.constant dense<0.000000e+00> : vector<8x8xf32>
    %83 = tpu.matmul %78, %80, %cst_52 {dimension_numbers = #tpu.dot_dimension_numbers<[1], [1], [0], [0], [0, 0, 1, 0], [], []>} : vector<8x8xbf16>, vector<8x8xbf16>, vector<8x8xf32> -> vector<8x8xf32>
    %cst_53 = arith.constant dense<0xFF800000> : vector<8xf32>
    %84 = vector.multi_reduction <maximumf>, %83, %cst_53 [1] : vector<8x8xf32> to vector<8xf32>
    %85 = vector.shape_cast %84 : vector<8xf32> to vector<8x1xf32>
    %86 = vector.broadcast %85 : vector<8x1xf32> to vector<8x8xf32>
    %87 = arith.subf %83, %86 : vector<8x8xf32>
    %88 = math.exp %87 : vector<8x8xf32>
    %cst_54 = arith.constant dense<0.000000e+00> : vector<8xf32>
    %89 = vector.multi_reduction <add>, %88, %cst_54 [1] : vector<8x8xf32> to vector<8xf32>
    %90 = vector.shape_cast %89 : vector<8xf32> to vector<8x1xf32>
    %91 = tpu.reciprocal %90 {approx = true} : vector<8x1xf32> -> vector<8x1xf32>
    %92 = vector.broadcast %91 : vector<8x1xf32> to vector<8x8xf32>
    %93 = arith.mulf %88, %92 : vector<8x8xf32>
    %94 = arith.truncf %93 : vector<8x8xf32> to vector<8x8xbf16>
    %cst_55 = arith.constant dense<0.000000e+00> : vector<8x8xf32>
    %95 = tpu.matmul %94, %82, %cst_55 {dimension_numbers = #tpu.dot_dimension_numbers<[1], [0], [0], [1], [0, 0, 1, 1], [], []>} : vector<8x8xbf16>, vector<8x8xbf16>, vector<8x8xf32> -> vector<8x8xf32>
    %96 = arith.truncf %95 : vector<8x8xf32> to vector<8x8xbf16>
    %c0_56 = arith.constant 0 : index
    %c0_57 = arith.constant 0 : index
    %c24_58 = arith.constant 24 : index
    %97 = vector.load %arg3[%c0_56, %c0_57, %c24_58] : memref<1x8x32xbf16, #tpu.memory_space<vmem>>, vector<1x8x8xbf16>
    %98 = vector.shape_cast %97 : vector<1x8x8xbf16> to vector<8x8xbf16>
    %99 = vector.shape_cast %96 : vector<8x8xbf16> to vector<1x8x8xbf16>
    tpu.vector_store %arg3[%c0_56, %c0_57, %c24_58], %99 {strides = array<i32>} : memref<1x8x32xbf16, #tpu.memory_space<vmem>>, vector<1x8x8xbf16>,
    return
  }
  func.func @transform_0(%arg0: i32) -> (i32, i32, i32) {
    %c0_i32 = arith.constant 0 : i32
    %c0_i32_0 = arith.constant 0 : i32
    %c0_i32_1 = arith.constant 0 : i32
    return %arg0, %c0_i32, %c0_i32_0 : i32, i32, i32
  }
  func.func @transform_1(%arg0: i32) -> (i32, i32, i32) {
    %c0_i32 = arith.constant 0 : i32
    %c0_i32_0 = arith.constant 0 : i32
    %c0_i32_1 = arith.constant 0 : i32
    return %arg0, %c0_i32, %c0_i32_0 : i32, i32, i32
  }
  func.func @transform_2(%arg0: i32) -> (i32, i32, i32) {
    %c0_i32 = arith.constant 0 : i32
    %c0_i32_0 = arith.constant 0 : i32
    %c0_i32_1 = arith.constant 0 : i32
    return %arg0, %c0_i32, %c0_i32_0 : i32, i32, i32
  }
}

module attributes {stable_mosaic.version = 11 : i64} {
  func.func @_ffn_kernel(%arg0: i32, %arg1: i32, %arg2: memref<16x32xbf16, #tpu.memory_space<vmem>>, %arg3: memref<32x64xbf16, #tpu.memory_space<vmem>>, %arg4: memref<1x64xf32, #tpu.memory_space<vmem>>, %arg5: memref<64x32xbf16, #tpu.memory_space<vmem>>, %arg6: memref<1x32xf32, #tpu.memory_space<vmem>>, %arg7: memref<1x32xf32, #tpu.memory_space<vmem>>, %arg8: memref<1x32xf32, #tpu.memory_space<vmem>>, %arg9: memref<16x32xbf16, #tpu.memory_space<vmem>>, %arg10: memref<16x32xf32, #tpu.memory_space<vmem>>) attributes {dimension_semantics = [#tpu.dimension_semantics<parallel>, #tpu.dimension_semantics<arbitrary>], iteration_bounds = array<i64: 1, 1>, scalar_prefetch = 0 : i64, scratch_operands = 1 : i64, tpu.core_type = #tpu.core_type<tc>, window_params = [{transform_indices = @transform_0, window_bounds = array<i64: 16, 32>}, {transform_indices = @transform_1, window_bounds = array<i64: 32, 64>}, {transform_indices = @transform_2, window_bounds = array<i64: 1, 64>}, {transform_indices = @transform_3, window_bounds = array<i64: 64, 32>}, {pipeline_mode = #tpu.pipeline_mode<synchronous>, transform_indices = @transform_4, window_bounds = array<i64: 1, 32>}, {pipeline_mode = #tpu.pipeline_mode<synchronous>, transform_indices = @transform_5, window_bounds = array<i64: 1, 32>}, {pipeline_mode = #tpu.pipeline_mode<synchronous>, transform_indices = @transform_6, window_bounds = array<i64: 1, 32>}, {transform_indices = @transform_7, window_bounds = array<i64: 16, 32>}]} {
    %c0_i32 = arith.constant 0 : i32
    %0 = arith.cmpi eq, %arg1, %c0_i32 : i32
    %1 = arith.extui %0 : i1 to i32
    %c0_i32_0 = arith.constant 0 : i32
    %2 = arith.cmpi ne, %1, %c0_i32_0 : i32
    scf.if %2 {
      %cst_16 = arith.constant 0.000000e+00 : f32
      %20 = vector.broadcast %cst_16 : f32 to vector<16x32xf32>
      %c0_17 = arith.constant 0 : index
      %c0_18 = arith.constant 0 : index
      %21 = vector.load %arg10[%c0_17, %c0_18] : memref<16x32xf32, #tpu.memory_space<vmem>>, vector<16x32xf32>
      tpu.vector_store %arg10[%c0_17, %c0_18], %20 {strides = array<i32>} : memref<16x32xf32, #tpu.memory_space<vmem>>, vector<16x32xf32>,
    } else {
    }
    %c0 = arith.constant 0 : index
    %c0_1 = arith.constant 0 : index
    %3 = vector.load %arg2[%c0, %c0_1] : memref<16x32xbf16, #tpu.memory_space<vmem>>, vector<16x32xbf16>
    %c0_2 = arith.constant 0 : index
    %c0_3 = arith.constant 0 : index
    %4 = vector.load %arg3[%c0_2, %c0_3] : memref<32x64xbf16, #tpu.memory_space<vmem>>, vector<32x64xbf16>
    %cst = arith.constant dense<0.000000e+00> : vector<16x64xf32>
    %5 = tpu.matmul %3, %4, %cst {dimension_numbers = #tpu.dot_dimension_numbers<[1], [0], [0], [1], [0, 0, 1, 1], [], []>} : vector<16x32xbf16>, vector<32x64xbf16>, vector<16x64xf32> -> vector<16x64xf32>
    %c0_4 = arith.constant 0 : index
    %c0_5 = arith.constant 0 : index
    %6 = vector.load %arg4[%c0_4, %c0_5] : memref<1x64xf32, #tpu.memory_space<vmem>>, vector<1x64xf32>
    %7 = vector.broadcast %6 : vector<1x64xf32> to vector<16x64xf32>
    %8 = arith.addf %5, %7 : vector<16x64xf32>
    %cst_6 = arith.constant 0.000000e+00 : f32
    %9 = vector.broadcast %cst_6 : f32 to vector<16x64xf32>
    %10 = arith.maximumf %8, %9 : vector<16x64xf32>
    %c0_7 = arith.constant 0 : index
    %c0_8 = arith.constant 0 : index
    %11 = vector.load %arg10[%c0_7, %c0_8] : memref<16x32xf32, #tpu.memory_space<vmem>>, vector<16x32xf32>
    %12 = arith.truncf %10 : vector<16x64xf32> to vector<16x64xbf16>
    %c0_9 = arith.constant 0 : index
    %c0_10 = arith.constant 0 : index
    %13 = vector.load %arg5[%c0_9, %c0_10] : memref<64x32xbf16, #tpu.memory_space<vmem>>, vector<64x32xbf16>
    %cst_11 = arith.constant dense<0.000000e+00> : vector<16x32xf32>
    %14 = tpu.matmul %12, %13, %cst_11 {dimension_numbers = #tpu.dot_dimension_numbers<[1], [0], [0], [1], [0, 0, 1, 1], [], []>} : vector<16x64xbf16>, vector<64x32xbf16>, vector<16x32xf32> -> vector<16x32xf32>
    %15 = arith.addf %11, %14 : vector<16x32xf32>
    %c0_12 = arith.constant 0 : index
    %c0_13 = arith.constant 0 : index
    %16 = vector.load %arg10[%c0_12, %c0_13] : memref<16x32xf32, #tpu.memory_space<vmem>>, vector<16x32xf32>
    tpu.vector_store %arg10[%c0_12, %c0_13], %15 {strides = array<i32>} : memref<16x32xf32, #tpu.memory_space<vmem>>, vector<16x32xf32>,
    %c0_i32_14 = arith.constant 0 : i32
    %17 = arith.cmpi eq, %arg1, %c0_i32_14 : i32
    %18 = arith.extui %17 : i1 to i32
    %c0_i32_15 = arith.constant 0 : i32
    %19 = arith.cmpi ne, %18, %c0_i32_15 : i32
    scf.if %19 {
      %c0_16 = arith.constant 0 : index
      %c0_17 = arith.constant 0 : index
      %20 = vector.load %arg10[%c0_16, %c0_17] : memref<16x32xf32, #tpu.memory_space<vmem>>, vector<16x32xf32>
      %c0_18 = arith.constant 0 : index
      %c0_19 = arith.constant 0 : index
      %21 = vector.load %arg6[%c0_18, %c0_19] : memref<1x32xf32, #tpu.memory_space<vmem>>, vector<1x32xf32>
      %22 = vector.broadcast %21 : vector<1x32xf32> to vector<16x32xf32>
      %23 = arith.addf %20, %22 : vector<16x32xf32>
      %c0_20 = arith.constant 0 : index
      %c0_21 = arith.constant 0 : index
      %24 = vector.load %arg2[%c0_20, %c0_21] : memref<16x32xbf16, #tpu.memory_space<vmem>>, vector<16x32xbf16>
      %25 = arith.extf %24 : vector<16x32xbf16> to vector<16x32xf32>
      %26 = arith.addf %23, %25 : vector<16x32xf32>
      %cst_22 = arith.constant dense<0.000000e+00> : vector<16xf32>
      %27 = vector.multi_reduction <add>, %26, %cst_22 [1] : vector<16x32xf32> to vector<16xf32>
      %28 = vector.shape_cast %27 : vector<16xf32> to vector<16x1xf32>
      %cst_23 = arith.constant 3.200000e+01 : f32
      %29 = vector.broadcast %cst_23 : f32 to vector<16x1xf32>
      %30 = arith.divf %28, %29 : vector<16x1xf32>
      %31 = vector.broadcast %30 : vector<16x1xf32> to vector<16x32xf32>
      %32 = arith.subf %26, %31 : vector<16x32xf32>
      %33 = arith.mulf %32, %32 : vector<16x32xf32>
      %cst_24 = arith.constant dense<0.000000e+00> : vector<16xf32>
      %34 = vector.multi_reduction <add>, %33, %cst_24 [1] : vector<16x32xf32> to vector<16xf32>
      %35 = vector.shape_cast %34 : vector<16xf32> to vector<16x1xf32>
      %cst_25 = arith.constant 3.200000e+01 : f32
      %36 = vector.broadcast %cst_25 : f32 to vector<16x1xf32>
      %37 = arith.divf %35, %36 : vector<16x1xf32>
      %cst_26 = arith.constant 9.99999974E-6 : f32
      %38 = vector.broadcast %cst_26 : f32 to vector<16x1xf32>
      %39 = arith.addf %37, %38 : vector<16x1xf32>
      %40 = math.rsqrt %39 : vector<16x1xf32>
      %41 = vector.broadcast %40 : vector<16x1xf32> to vector<16x32xf32>
      %42 = arith.mulf %32, %41 : vector<16x32xf32>
      %c0_27 = arith.constant 0 : index
      %c0_28 = arith.constant 0 : index
      %43 = vector.load %arg7[%c0_27, %c0_28] : memref<1x32xf32, #tpu.memory_space<vmem>>, vector<1x32xf32>
      %44 = vector.broadcast %43 : vector<1x32xf32> to vector<16x32xf32>
      %45 = arith.mulf %42, %44 : vector<16x32xf32>
      %c0_29 = arith.constant 0 : index
      %c0_30 = arith.constant 0 : index
      %46 = vector.load %arg8[%c0_29, %c0_30] : memref<1x32xf32, #tpu.memory_space<vmem>>, vector<1x32xf32>
      %47 = vector.broadcast %46 : vector<1x32xf32> to vector<16x32xf32>
      %48 = arith.addf %45, %47 : vector<16x32xf32>
      %49 = arith.truncf %48 : vector<16x32xf32> to vector<16x32xbf16>
      %c0_31 = arith.constant 0 : index
      %c0_32 = arith.constant 0 : index
      %50 = vector.load %arg9[%c0_31, %c0_32] : memref<16x32xbf16, #tpu.memory_space<vmem>>, vector<16x32xbf16>
      tpu.vector_store %arg9[%c0_31, %c0_32], %49 {strides = array<i32>} : memref<16x32xbf16, #tpu.memory_space<vmem>>, vector<16x32xbf16>,
    } else {
    }
    return
  }
  func.func @transform_0(%arg0: i32, %arg1: i32) -> (i32, i32) {
    %c0_i32 = arith.constant 0 : i32
    %c0_i32_0 = arith.constant 0 : i32
    return %arg0, %c0_i32 : i32, i32
  }
  func.func @transform_1(%arg0: i32, %arg1: i32) -> (i32, i32) {
    %c0_i32 = arith.constant 0 : i32
    %c0_i32_0 = arith.constant 0 : i32
    return %c0_i32, %arg1 : i32, i32
  }
  func.func @transform_2(%arg0: i32, %arg1: i32) -> (i32, i32) {
    %c0_i32 = arith.constant 0 : i32
    %c0_i32_0 = arith.constant 0 : i32
    return %c0_i32, %arg1 : i32, i32
  }
  func.func @transform_3(%arg0: i32, %arg1: i32) -> (i32, i32) {
    %c0_i32 = arith.constant 0 : i32
    %c0_i32_0 = arith.constant 0 : i32
    return %arg1, %c0_i32 : i32, i32
  }
  func.func @transform_4(%arg0: i32, %arg1: i32) -> (i32, i32) {
    %c0_i32 = arith.constant 0 : i32
    %c0_i32_0 = arith.constant 0 : i32
    %c0_i32_1 = arith.constant 0 : i32
    return %c0_i32, %c0_i32_0 : i32, i32
  }
  func.func @transform_5(%arg0: i32, %arg1: i32) -> (i32, i32) {
    %c0_i32 = arith.constant 0 : i32
    %c0_i32_0 = arith.constant 0 : i32
    %c0_i32_1 = arith.constant 0 : i32
    return %c0_i32, %c0_i32_0 : i32, i32
  }
  func.func @transform_6(%arg0: i32, %arg1: i32) -> (i32, i32) {
    %c0_i32 = arith.constant 0 : i32
    %c0_i32_0 = arith.constant 0 : i32
    %c0_i32_1 = arith.constant 0 : i32
    return %c0_i32, %c0_i32_0 : i32, i32
  }
  func.func @transform_7(%arg0: i32, %arg1: i32) -> (i32, i32) {
    %c0_i32 = arith.constant 0 : i32
    %c0_i32_0 = arith.constant 0 : i32
    return %arg0, %c0_i32 : i32, i32
  }
}

module attributes {stable_mosaic.version = 11 : i64} {
  func.func @_ln_kernel(%arg0: i32, %arg1: memref<16x32xbf16, #tpu.memory_space<vmem>>, %arg2: memref<1x32xf32, #tpu.memory_space<vmem>>, %arg3: memref<1x32xf32, #tpu.memory_space<vmem>>, %arg4: memref<16x32xf32, #tpu.memory_space<vmem>>) attributes {dimension_semantics = [#tpu.dimension_semantics<parallel>], iteration_bounds = array<i64: 1>, scalar_prefetch = 0 : i64, scratch_operands = 0 : i64, tpu.core_type = #tpu.core_type<tc>, window_params = [{transform_indices = @transform_0, window_bounds = array<i64: 16, 32>}, {pipeline_mode = #tpu.pipeline_mode<synchronous>, transform_indices = @transform_1, window_bounds = array<i64: 1, 32>}, {pipeline_mode = #tpu.pipeline_mode<synchronous>, transform_indices = @transform_2, window_bounds = array<i64: 1, 32>}, {transform_indices = @transform_3, window_bounds = array<i64: 16, 32>}]} {
    %c0 = arith.constant 0 : index
    %c0_0 = arith.constant 0 : index
    %0 = vector.load %arg1[%c0, %c0_0] : memref<16x32xbf16, #tpu.memory_space<vmem>>, vector<16x32xbf16>
    %1 = arith.extf %0 : vector<16x32xbf16> to vector<16x32xf32>
    %cst = arith.constant dense<0.000000e+00> : vector<16xf32>
    %2 = vector.multi_reduction <add>, %1, %cst [1] : vector<16x32xf32> to vector<16xf32>
    %3 = vector.shape_cast %2 : vector<16xf32> to vector<16x1xf32>
    %cst_1 = arith.constant 3.200000e+01 : f32
    %4 = vector.broadcast %cst_1 : f32 to vector<16x1xf32>
    %5 = arith.divf %3, %4 : vector<16x1xf32>
    %6 = vector.broadcast %5 : vector<16x1xf32> to vector<16x32xf32>
    %7 = arith.subf %1, %6 : vector<16x32xf32>
    %8 = arith.mulf %7, %7 : vector<16x32xf32>
    %cst_2 = arith.constant dense<0.000000e+00> : vector<16xf32>
    %9 = vector.multi_reduction <add>, %8, %cst_2 [1] : vector<16x32xf32> to vector<16xf32>
    %10 = vector.shape_cast %9 : vector<16xf32> to vector<16x1xf32>
    %cst_3 = arith.constant 3.200000e+01 : f32
    %11 = vector.broadcast %cst_3 : f32 to vector<16x1xf32>
    %12 = arith.divf %10, %11 : vector<16x1xf32>
    %cst_4 = arith.constant 9.99999974E-6 : f32
    %13 = vector.broadcast %cst_4 : f32 to vector<16x1xf32>
    %14 = arith.addf %12, %13 : vector<16x1xf32>
    %15 = math.rsqrt %14 : vector<16x1xf32>
    %16 = vector.broadcast %15 : vector<16x1xf32> to vector<16x32xf32>
    %17 = arith.mulf %7, %16 : vector<16x32xf32>
    %c0_5 = arith.constant 0 : index
    %c0_6 = arith.constant 0 : index
    %18 = vector.load %arg2[%c0_5, %c0_6] : memref<1x32xf32, #tpu.memory_space<vmem>>, vector<1x32xf32>
    %19 = vector.broadcast %18 : vector<1x32xf32> to vector<16x32xf32>
    %20 = arith.mulf %17, %19 : vector<16x32xf32>
    %c0_7 = arith.constant 0 : index
    %c0_8 = arith.constant 0 : index
    %21 = vector.load %arg3[%c0_7, %c0_8] : memref<1x32xf32, #tpu.memory_space<vmem>>, vector<1x32xf32>
    %22 = vector.broadcast %21 : vector<1x32xf32> to vector<16x32xf32>
    %23 = arith.addf %20, %22 : vector<16x32xf32>
    %c0_9 = arith.constant 0 : index
    %c0_10 = arith.constant 0 : index
    %24 = vector.load %arg4[%c0_9, %c0_10] : memref<16x32xf32, #tpu.memory_space<vmem>>, vector<16x32xf32>
    tpu.vector_store %arg4[%c0_9, %c0_10], %23 {strides = array<i32>} : memref<16x32xf32, #tpu.memory_space<vmem>>, vector<16x32xf32>,
    return
  }
  func.func @transform_0(%arg0: i32) -> (i32, i32) {
    %c0_i32 = arith.constant 0 : i32
    %c0_i32_0 = arith.constant 0 : i32
    return %arg0, %c0_i32 : i32, i32
  }
  func.func @transform_1(%arg0: i32) -> (i32, i32) {
    %c0_i32 = arith.constant 0 : i32
    %c0_i32_0 = arith.constant 0 : i32
    %c0_i32_1 = arith.constant 0 : i32
    return %c0_i32, %c0_i32_0 : i32, i32
  }
  func.func @transform_2(%arg0: i32) -> (i32, i32) {
    %c0_i32 = arith.constant 0 : i32
    %c0_i32_0 = arith.constant 0 : i32
    %c0_i32_1 = arith.constant 0 : i32
    return %c0_i32, %c0_i32_0 : i32, i32
  }
  func.func @transform_3(%arg0: i32) -> (i32, i32) {
    %c0_i32 = arith.constant 0 : i32
    %c0_i32_0 = arith.constant 0 : i32
    return %arg0, %c0_i32 : i32, i32
  }
}

</mosaic_0001>

<bundles_post_ra>
// kernel: transformer_decoder.29
= control target key start
LH: loop header
LB: loop body
LE: loop exit
PB: predicated region body
PF: predicated region fallthrough
CT: control target
= control target key end

     0   :  { %vm19_vm0 = vcmask 523264   ;;  %v151_v0 = vmov 0.0   ;;  %vm152_vm1 = vmmov 0   ;;  %vm47_vm2 = vcmask 261120   ;;  %s195_s1 = inlined_call_operand.vmem [shape: bf16[32,64], index: 1, kind: input, shape index: {}]   ;;  %s196_s0 = inlined_call_operand.vmem [shape: bf16[16,32], index: 0, kind: input, shape index: {}]   ;;  %s197_s2 = inlined_call_operand.vmem [shape: f32[1,64], index: 2, kind: input, shape index: {}]   ;;  %s198_s3 = inlined_call_operand.vmem [shape: bf16[16,64], index: 3, kind: output, shape index: {}]  }
   0x1   :  { %138 = vmatprep.subr.bf16.mxu0 %v151_v0  ;;  %v148_v1 = vld [vmem:[%s195_s1] sm:$0xff]   ;;  %142 = vmatprep.mubr.msk.bf16.mxu0 %vm152_vm1, %v151_v0  ;;  %20 = vst.msk [vmem:[#allocation2] sm:$0xff] %vm19_vm0, %v151_v0  ;;  %21 = vst.msk [vmem:[#allocation2 + $0x8] sm:$0xff] %vm19_vm0, %v151_v0  ;;  %v149_v2 = vld [vmem:[%s195_s1 + $0x8] sm:$0xff]   ;;  %vm119_vm3 = vcmask 519168  }
   0x2   :  { %139 = vmatpush3.bf16.msra.mxu0 %v148_v1  ;;  %v150_v3 = vld [vmem:[%s196_s0] sm:$0xff]  }
   0x3   :  { %140 = vmatprep.subr.bf16.mxu0 %v151_v0  ;;  %v130_v12 = vld [vmem:[%s197_s2] ss:$0 sm:$0xff] }
   0x6   :  { %141 = vmatpush3.bf16.msra.mxu0 %v149_v2 }
   0x8   :  { %v22_v4 = vld [vmem:[#allocation2] sm:$0xff]  ;;  %v23_v6 = vld [vmem:[#allocation2 + $0x8] sm:$0xff] }
   0x9   :  { %143 = vmatmul.mubr.msk.bf16.vlgmr.msra.gmra.mrb[0].mxu0 %vm47_vm2, %v150_v3 }
  0xdc   :  { %v85_v5 = vpop.f32.mrb[0].mxu0 }
  0xdd   :  { %v92_v7 = vadd.f32 %v85_v5, %v22_v4  ;;  %v144_v8 = vpop.f32.mrb[1].mxu0 }
  0xde   :  { %v88_v9 = vpop.f32.mrb[2].mxu0 }
  0xdf   :  { %95 = vst.msk [vmem:[#allocation2] sm:$0xff] %vm19_vm0, %v92_v7  ;;  %v93_v10 = vadd.f32 %v88_v9, %v23_v6  ;;  %v145_v11 = vpop.f32.mrb[3].mxu0 }
  0xe1   :  { %96 = vst.msk [vmem:[#allocation2 + $0x8] sm:$0xff] %vm19_vm0, %v93_v10 }
  0xe6   :  { %v100_v13 = vld [vmem:[#allocation2] sm:$0xff] }
  0xe7   :  { %v109_v14 = vadd.f32 %v130_v12, %v100_v13 }
  0xe8   :  { %v101_v15 = vld [vmem:[#allocation2 + $0x8] sm:$0xff] }
  0xe9   :  { %v133_v16 = vpack.c.bf16 %v109_v14, %v109_v14  ;;  %v110_v17 = vadd.f32 %v130_v12, %v101_v15 }
  0xeb   :  { %120 = vst.msk [vmem:[%s198_s3] sm:$0xf] %vm119_vm3, %v133_v16  ;;  %v134_v18 = vpack.c.bf16 %v110_v17, %v110_v17 }
  0xed   :  { %121 = vst.msk [vmem:[%s198_s3 + $0x4] sm:$0xf] %vm119_vm3, %v134_v18 }

// kernel: transformer_decoder.17
= control target key start
LH: loop header
LB: loop body
LE: loop exit
PB: predicated region body
PF: predicated region fallthrough
CT: control target
= control target key end

     0   :  { %vm19_vm0 = vcmask 785408   ;;  %v151_v0 = vmov 0.0   ;;  %vm152_vm1 = vmmov 0   ;;  %vm47_vm2 = vcmask 261120   ;;  %s195_s1 = inlined_call_operand.vmem [shape: bf16[32,96], index: 1, kind: input, shape index: {}]   ;;  %s196_s0 = inlined_call_operand.vmem [shape: bf16[16,32], index: 0, kind: input, shape index: {}]   ;;  %s197_s2 = inlined_call_operand.vmem [shape: f32[1,96], index: 2, kind: input, shape index: {}]   ;;  %s198_s3 = inlined_call_operand.vmem [shape: bf16[16,96], index: 3, kind: output, shape index: {}]  }
   0x1   :  { %138 = vmatprep.subr.bf16.mxu0 %v151_v0  ;;  %v148_v1 = vld [vmem:[%s195_s1] sm:$0xff]   ;;  %142 = vmatprep.mubr.msk.bf16.mxu0 %vm152_vm1, %v151_v0  ;;  %20 = vst.msk [vmem:[#allocation2] sm:$0xff] %vm19_vm0, %v151_v0  ;;  %21 = vst.msk [vmem:[#allocation2 + $0x8] sm:$0xff] %vm19_vm0, %v151_v0  ;;  %v149_v2 = vld [vmem:[%s195_s1 + $0x8] sm:$0xff]   ;;  %vm119_vm3 = vcmask 781312  }
   0x2   :  { %139 = vmatpush3.bf16.msra.mxu0 %v148_v1  ;;  %v150_v3 = vld [vmem:[%s196_s0] sm:$0xff]  }
   0x3   :  { %140 = vmatprep.subr.bf16.mxu0 %v151_v0  ;;  %v130_v12 = vld [vmem:[%s197_s2] ss:$0 sm:$0xff] }
   0x6   :  { %141 = vmatpush3.bf16.msra.mxu0 %v149_v2 }
   0x8   :  { %v22_v4 = vld [vmem:[#allocation2] sm:$0xff]  ;;  %v23_v6 = vld [vmem:[#allocation2 + $0x8] sm:$0xff] }
   0x9   :  { %143 = vmatmul.mubr.msk.bf16.vlgmr.msra.gmra.mrb[0].mxu0 %vm47_vm2, %v150_v3 }
  0xdc   :  { %v85_v5 = vpop.f32.mrb[0].mxu0 }
  0xdd   :  { %v92_v7 = vadd.f32 %v85_v5, %v22_v4  ;;  %v144_v8 = vpop.f32.mrb[1].mxu0 }
  0xde   :  { %v88_v9 = vpop.f32.mrb[2].mxu0 }
  0xdf   :  { %95 = vst.msk [vmem:[#allocation2] sm:$0xff] %vm19_vm0, %v92_v7  ;;  %v93_v10 = vadd.f32 %v88_v9, %v23_v6  ;;  %v145_v11 = vpop.f32.mrb[3].mxu0 }
  0xe1   :  { %96 = vst.msk [vmem:[#allocation2 + $0x8] sm:$0xff] %vm19_vm0, %v93_v10 }
  0xe6   :  { %v100_v13 = vld [vmem:[#allocation2] sm:$0xff] }
  0xe7   :  { %v109_v14 = vadd.f32 %v130_v12, %v100_v13 }
  0xe8   :  { %v101_v15 = vld [vmem:[#allocation2 + $0x8] sm:$0xff] }
  0xe9   :  { %v133_v16 = vpack.c.bf16 %v109_v14, %v109_v14  ;;  %v110_v17 = vadd.f32 %v130_v12, %v101_v15 }
  0xeb   :  { %120 = vst.msk [vmem:[%s198_s3] sm:$0xf] %vm119_vm3, %v133_v16  ;;  %v134_v18 = vpack.c.bf16 %v110_v17, %v110_v17 }
  0xed   :  { %121 = vst.msk [vmem:[%s198_s3 + $0x4] sm:$0xf] %vm119_vm3, %v134_v18 }

// kernel: transformer_decoder.19
= control target key start
LH: loop header
LB: loop body
LE: loop exit
PB: predicated region body
PF: predicated region fallthrough
CT: control target
= control target key end

     0   :  { %vm28_vm0 = vcmask 261120   ;;  %v220_v0 = vmov 0.0   ;;  %vm221_vm1 = vmmov 0   ;;  %vm178_vm2 = vcmask 257024   ;;  %s293_s1 = inlined_call_operand.vmem [shape: bf16[32,32], index: 1, kind: input, shape index: {}]   ;;  %s294_s0 = inlined_call_operand.vmem [shape: bf16[16,32], index: 0, kind: input, shape index: {}]   ;;  %s295_s3 = inlined_call_operand.vmem [shape: bf16[16,32], index: 3, kind: input, shape index: {}]   ;;  %s296_s2 = inlined_call_operand.vmem [shape: f32[1,32], index: 2, kind: input, shape index: {}]   ;;  %s297_s4 = inlined_call_operand.vmem [shape: f32[1,32], index: 4, kind: input, shape index: {}]   ;;  %s298_s5 = inlined_call_operand.vmem [shape: f32[1,32], index: 5, kind: input, shape index: {}]   ;;  %s299_s6 = inlined_call_operand.vmem [shape: bf16[16,32], index: 6, kind: output, shape index: {}]  }
   0x1   :  { %203 = vmatprep.subr.bf16.mxu0 %v220_v0  ;;  %v213_v1 = vld [vmem:[%s293_s1] sm:$0xff]   ;;  %207 = vmatprep.mubr.msk.bf16.mxu0 %vm221_vm1, %v220_v0  ;;  %29 = vst.msk [vmem:[#allocation2] sm:$0xff] %vm28_vm0, %v220_v0  ;;  %30 = vst.msk [vmem:[#allocation2 + $0x8] sm:$0xff] %vm28_vm0, %v220_v0  ;;  %v214_v2 = vld [vmem:[%s293_s1 + $0x8] sm:$0xff]  }
   0x2   :  { %204 = vmatpush3.bf16.msra.mxu0 %v213_v1  ;;  %v215_v3 = vld [vmem:[%s294_s0] sm:$0xff]  }
   0x3   :  { %205 = vmatprep.subr.bf16.mxu0 %v220_v0  ;;  %v197_v12 = vld [vmem:[%s295_s3] sm:$0xff]  }
   0x4   :  { %v189_v13 = vld [vmem:[%s296_s2] ss:$0 sm:$0xff]  ;;  %v198_v14 = vunpack.c.l.bf16 %v197_v12  ;;  %v199_v17 = vunpack.c.h.bf16 %v197_v12 }
   0x5   :  { %v190_v41 = vld [vmem:[%s297_s4] ss:$0 sm:$0xff] }
   0x6   :  { %206 = vmatpush3.bf16.msra.mxu0 %v214_v2  ;;  %v191_v43 = vld [vmem:[%s298_s5] ss:$0 sm:$0xff] }
   0x8   :  { %v31_v4 = vld [vmem:[#allocation2] sm:$0xff]  ;;  %v32_v6 = vld [vmem:[#allocation2 + $0x8] sm:$0xff] }
   0x9   :  { %208 = vmatmul.mubr.msk.bf16.vlgmr.msra.gmra.mrb[0].mxu0 %vm28_vm0, %v215_v3 }
  0xdc   :  { %v94_v5 = vpop.f32.mrb[0].mxu0 }
  0xdd   :  { %v101_v7 = vadd.f32 %v94_v5, %v31_v4  ;;  %v209_v8 = vpop.f32.mrb[1].mxu0 }
  0xde   :  { %v97_v9 = vpop.f32.mrb[2].mxu0 }
  0xdf   :  { %103 = vst.msk [vmem:[#allocation2] sm:$0xff] %vm28_vm0, %v101_v7  ;;  %v102_v10 = vadd.f32 %v97_v9, %v32_v6  ;;  %v210_v11 = vpop.f32.mrb[3].mxu0 }
  0xe1   :  { %104 = vst.msk [vmem:[#allocation2 + $0x8] sm:$0xff] %vm28_vm0, %v102_v10 }
  0xe6   :  { %v108_v15 = vld [vmem:[#allocation2] sm:$0xff] }
  0xe7   :  { %v117_v16 = vadd.f32 %v189_v13, %v108_v15 }
  0xe8   :  { %v109_v18 = vld [vmem:[#allocation2 + $0x8] sm:$0xff] }
  0xe9   :  { %v123_v19 = vadd.f32 %v198_v14, %v117_v16  ;;  %v118_v20 = vadd.f32 %v189_v13, %v109_v18 }
  0xeb   :  { %v125_v21 = vsel %vm28_vm0, %v123_v19, 0.0  ;;  %v124_v22 = vadd.f32 %v199_v17, %v118_v20 }
  0xec   :  { %126 = vadd.xlane.f32.xlu0 %v125_v21 }
  0xed   :  { %v128_v23 = vsel %vm28_vm0, %v124_v22, 0.0 }
  0xf0   :  { %129 = vadd.xlane.f32.xlu0 %v128_v23 }
 0x179   :  { %v127_v24 = vpop.xlane.xlu0 %126 }
 0x17a   :  { %v132_v25 = vmul.f32 0.03125, %v127_v24 }
 0x17c   :  { %v134_v26 = vsub.f32 %v123_v19, %v132_v25 }
 0x17d   :  { %v130_v27 = vpop.xlane.xlu0 %129 }
 0x17e   :  { %v133_v28 = vmul.f32 0.03125, %v130_v27  ;;  %v136_v29 = vmul.f32 %v134_v26, %v134_v26 }
 0x180   :  { %v135_v30 = vsub.f32 %v124_v22, %v133_v28  ;;  %v138_v31 = vsel %vm28_vm0, %v136_v29, 0.0 }
 0x181   :  { %139 = vadd.xlane.f32.xlu1 %v138_v31 }
 0x182   :  { %v137_v32 = vmul.f32 %v135_v30, %v135_v30 }
 0x184   :  { %v141_v33 = vsel %vm28_vm0, %v137_v32, 0.0 }
 0x185   :  { %142 = vadd.xlane.f32.xlu1 %v141_v33 }
 0x20e   :  { %v140_v34 = vpop.xlane.xlu1 %139 }
 0x20f   :  { %v144_v35 = vmul.f32 0.03125, %v140_v34 }
 0x211   :  { %v146_v36 = vadd.f32 1e-05, %v144_v35 }
 0x212   :  { %v143_v37 = vpop.xlane.xlu1 %142 }
 0x213   :  { %216 = vrsqrt.f32 %v146_v36  ;;  %v145_v38 = vmul.f32 0.03125, %v143_v37 }
 0x215   :  { %v147_v39 = vadd.f32 1e-05, %v145_v38 }
 0x217   :  { %218 = vrsqrt.f32 %v147_v39 }
 0x21d   :  { %v217_v40 = vpop.eup %216 }
 0x21e   :  { %v150_v42 = vmul.f32 %v217_v40, %v134_v26 }
 0x220   :  { %v159_v44 = vmul.f32 %v190_v41, %v150_v42 }
 0x221   :  { %v219_v45 = vpop.eup %218 }
 0x222   :  { %v168_v46 = vadd.f32 %v191_v43, %v159_v44  ;;  %v151_v47 = vmul.f32 %v219_v45, %v135_v30 }
 0x224   :  { %v194_v48 = vpack.c.bf16 %v168_v46, %v168_v46  ;;  %v160_v49 = vmul.f32 %v190_v41, %v151_v47 }
 0x226   :  { %179 = vst.msk [vmem:[%s299_s6] sm:$0xf] %vm178_vm2, %v194_v48  ;;  %v169_v50 = vadd.f32 %v191_v43, %v160_v49 }
 0x228   :  { %v195_v51 = vpack.c.bf16 %v169_v50, %v169_v50 }
 0x22a   :  { %180 = vst.msk [vmem:[%s299_s6 + $0x4] sm:$0xf] %vm178_vm2, %v195_v51 }

// kernel: transformer_decoder.18
= control target key start
LH: loop header
LB: loop body
LE: loop exit
PB: predicated region body
PF: predicated region fallthrough
CT: control target
= control target key end

     0   :  { %s872_s9 = smov 0   ;;  %s977_s0 = inlined_call_operand.vmem [shape: bf16[2,8,96], index: 0, kind: input, shape index: {}]   ;;  %s978_s1 = inlined_call_operand.vmem [shape: bf16[8,8], index: 1, kind: input, shape index: {}]   ;;  %s979_s2 = inlined_call_operand.vmem [shape: bf16[2,8,32], index: 2, kind: output, shape index: {}]  }
   0x1 LB: > { %s695_s10 = sadd.s32 4294967295, %s839_s9   ;;  %p699_p0 = scmp.ge.s32.totalorder %s839_s9, 1  ;;  %s839_s9 = sphi %s872_s9, %s12_s9  }
   0x2   : > { %p111_p1 = scmp.lt.s32.totalorder %s839_s9, 3 }
   0x4   : > { %p112_p2 = pnand %p699_p0, %p111_p1 }
   0x5   : > { %p131_p3 = scmp.lt.s32.totalorder (!%p112_p2), %s695_s10, 1  ;;  %v841_v0 = vmov (!%p112_p2), 0.0   ;;  %vm842_vm0 = vmmov (!%p112_p2), 0   ;;  %s843_s15 = smov (!%p112_p2), 96   ;;  %vm150_vm1 = vcmask (!%p112_p2), 64512   ;;  %vm214_vm2 = vcmask (!%p112_p2), 1043456  }
   0x6   : > { %115 = sbr.rel (%p112_p2) target bundleno = 1601 (0x641), region = 28  ;;  %741 = vmatprep.subr.bf16.mxu0 (!%p112_p2), %v841_v0  ;;  %743 = vmatprep.mubr.msk.bf16.mxu0 (!%p112_p2), %vm842_vm0, %v841_v0  ;;  %s844_s16 = smov (!%p112_p2), 64   ;;  %v141_v8 = vld [vmem:[%s978_s1] sm:$0xf] (!%p112_p2)  ;;  %vm259_vm3 = vcmask (!%p112_p2), 60416   ;;  %vm386_vm4 = vcmask (!%p112_p2), 126016  }
   0x7   : > { %747 = vmatprep.subr.bf16.mxu1 (!%p112_p2), %v841_v0  ;;  %749 = vmatprep.mubr.msk.bf16.mxu1 (!%p112_p2), %vm842_vm0, %v841_v0  ;;  %s845_s17 = smov (!%p112_p2), 88   ;;  %v909_v9 = vunpack.c.l.bf16 (!%p112_p2), %v141_v8  ;;  %s846_s20 = smov (!%p112_p2), 72   ;;  %vm513_vm5 = vcmask (!%p112_p2), 191616   ;;  %vm640_vm6 = vcmask (!%p112_p2), 257216  }
   0x8   : > { %s847_s21 = smov (!%p112_p2), 120   ;;  %s848_s22 = smov (!%p112_p2), 80  }
   0x9   : > { %s849_s23 = smov (!%p112_p2), 112   ;;  %s850_s24 = smov (!%p112_p2), 104  }
   0xa   : > { %s851_s28 = smov (!%p112_p2), 56   ;;  %s852_s29 = smov (!%p112_p2), 48  }
   0xb   : > { %s853_s30 = smov (!%p112_p2), 40   ;;  %s854_s3 = smov (!%p112_p2), 8  }
   0xc   : > { %s855_s4 = smov (!%p112_p2), 16   ;;  %s856_s5 = smov (!%p112_p2), 24  }
   0xd   : > { %s981_s10 = smov (!%p131_p3, %s695_s10), 1 }
   0xe   : > { %s700_s11 = sshll.u32 %s981_s10, 2 }
   0xf   : > { %s894_s14 = scalar_lea.vmem %s977_s0, %s700_s11  ;;  %s944_s27 = scalar_lea.vmem %s979_s2, %s700_s11 }
  0x10   : > { %v143_v1 = vld [vmem:[%s894_s14] sm:$0xf] }
  0x11   : > { %v702_v2 = vcombine.low %v143_v1, %v143_v1  ;;  %v144_v5 = vmul.bf16 1052065461, %v143_v1  ;;  %v261_v6 = vld [vmem:[%s894_s14] sm:$0xf] }
  0x12   : > { %v903_v7 = vcombine.low %v261_v6, %v261_v6  ;;  %v515_v16 = vld [vmem:[%s894_s14] sm:$0xf]  ;;  %v262_v25 = vmul.bf16 1052065461, %v261_v6 }
  0x13   : > { %148 = vrot.lane.b32.xlu0 %v702_v2, %s843_s15  ;;  %209 = vrot.lane.b32.xlu1 %v702_v2, %s844_s16  ;;  %v914_v17 = vcombine.low %v515_v16, %v515_v16  ;;  %v388_v27 = vld [vmem:[%s894_s14] sm:$0xf]  ;;  %v516_v31 = vmul.bf16 1052065461, %v515_v16 }
  0x14   : > { %v705_v26 = vcombine.low %v262_v25, %v262_v25  ;;  %v921_v28 = vcombine.low %v388_v27, %v388_v27  ;;  %v389_v29 = vmul.bf16 1052065461, %v388_v27 }
  0x15   : > { %v715_v32 = vcombine.low %v516_v31, %v516_v31 }
  0x16   : > { %v710_v30 = vcombine.low %v389_v29, %v389_v29 }
  0x17   : > { %271 = vrot.lane.b32.xlu1 %v903_v7, %s845_s17 }
  0x85   : > { %v149_v3 = vpop.permute.xlu0 %148  ;;  %v210_v18 = vpop.permute.xlu1 %209 }
  0x86   : > { %v155_v4 = vsel %vm150_vm1, %v149_v3, 0  ;;  %v216_v19 = vsel %vm214_vm2, %v210_v18, 0 }
  0x87   : > { %742 = vmatpush3.bf16.xpose.msra.mxu0 %v155_v4  ;;  %748 = vmatpush3.bf16.msra.mxu1 %v216_v19 }
  0x88   : > { %759 = vmatprep.subr.bf16.mxu0 %v841_v0  ;;  %753 = vmatprep.subr.bf16.mxu1 %v841_v0 }
  0x89   : > { %v272_v33 = vpop.permute.xlu1 %271 }
  0x8a   : > { %v277_v39 = vsel %vm150_vm1, %v272_v33, 0 }
  0x8e   : > { %744 = vmatmul.mubr.msk.bf16.vlgmr.msra.gmra.mrb[0].mxu0 %vm150_vm1, %v144_v5 }
  0x8f   : > { %761 = vmatprep.mubr.msk.bf16.mxu0 %vm842_vm0, %v841_v0 }
 0x161   : > { %v191_v10 = vpop.f32.mrb[0].mxu0 }
 0x162   : > { %v192_v11 = vadd.f32 %v191_v10, %v909_v9  ;;  %v745_v12 = vpop.f32.mrb[1].mxu0 }
 0x163   : > { %v194_v13 = vpop.f32.mrb[2].mxu0 }
 0x164   : > { %v746_v14 = vpop.f32.mrb[3].mxu0  ;;  %v197_v15 = vsel %vm150_vm1, %v192_v11, -inf }
 0x165   : > { %198 = vmax.xlane.f32.xlu0 %v197_v15 }
 0x17b   : > { %525 = vrot.lane.b32.xlu0 %v914_v17, %s846_s20 }
 0x1f2   : > { %v199_v20 = vpop.xlane.xlu0 %198 }
 0x1f3   : > { %v200_v21 = vsub.f32 %v192_v11, %v199_v20 }
 0x1f5   : > { %v201_v22 = vmul.f32 1.442695, %v200_v21 }
 0x1f6   : > { %v526_v42 = vpop.permute.xlu0 %525 }
 0x1f7   : > { %817 = vpow2.f32 %v201_v22  ;;  %v531_v44 = vsel %vm150_vm1, %v526_v42, 0 }
 0x201   : > { %v818_v23 = vpop.eup %817 }
 0x202   : > { %v203_v24 = vsel %vm150_vm1, %v818_v23, 0.0 }
 0x203   : > { %204 = vadd.xlane.f32.xlu1 %v203_v24 }
 0x214   : > { %266 = vrot.lane.b32.xlu1 %v705_v26, %s847_s21 }
 0x218   : > { %398 = vrot.lane.b32.xlu1 %v921_v28, %s848_s22 }
 0x21c   : > { %393 = vrot.lane.b32.xlu1 %v710_v30, %s849_s23 }
 0x220   : > { %520 = vrot.lane.b32.xlu1 %v715_v32, %s850_s24 }
 0x290   : > { %v205_v34 = vpop.xlane.xlu1 %204 }
 0x291   : > { %819 = vrcp.f32 %v205_v34 }
 0x294   : > { %v267_v37 = vpop.permute.xlu1 %266 }
 0x298   : > { %v399_v40 = vpop.permute.xlu1 %398 }
 0x299   : > { %v404_v41 = vsel %vm150_vm1, %v399_v40, 0 }
 0x29b   : > { %v820_v35 = vpop.eup %819 }
 0x29c   : > { %v207_v36 = vmul.f32 %v820_v35, %v818_v23  ;;  %v394_v43 = vpop.permute.xlu1 %393 }
 0x29e   : > { %v208_v38 = vpack.c.bf16 %v207_v36, %v207_v36 }
 0x2a0   : > { %750 = vmatmul.mubr.msk.bf16.vlgmr.msra.gmra.mrb[0].mxu1 %vm150_vm1, %v208_v38  ;;  %v521_v45 = vpop.permute.xlu1 %520 }
 0x2a1   : > { %754 = vmatpush3.bf16.xpose.msra.mxu1 %v277_v39  ;;  %755 = vmatprep.mubr.msk.bf16.mxu1 %vm842_vm0, %v841_v0 }
 0x2a2   : > { %765 = vmatprep.subr.bf16.mxu1 %v841_v0 }
 0x2a8   : > { %756 = vmatmul.mubr.msk.bf16.vlgmr.msra.gmra.mrb[4].mxu1 %vm150_vm1, %v267_v37 }
 0x2a9   : > { %766 = vmatpush3.bf16.xpose.msra.mxu1 %v404_v41  ;;  %767 = vmatprep.mubr.msk.bf16.mxu1 %vm842_vm0, %v841_v0 }
 0x2aa   : > { %777 = vmatprep.subr.bf16.mxu1 %v841_v0 }
 0x2b0   : > { %768 = vmatmul.mubr.msk.bf16.vlgmr.msra.gmra.mrb[8].mxu1 %vm150_vm1, %v394_v43 }
 0x2b1   : > { %778 = vmatpush3.bf16.xpose.msra.mxu1 %v531_v44  ;;  %779 = vmatprep.mubr.msk.bf16.mxu1 %vm842_vm0, %v841_v0 }
 0x2b8   : > { %780 = vmatmul.mubr.msk.bf16.vlgmr.msra.gmra.mrb[12].mxu1 %vm150_vm1, %v521_v45 }
 0x373   : > { %v252_v46 = vpop.f32.mrb[0].mxu1 }
 0x374   : > { %v258_v47 = vpack.c.bf16 %v252_v46, %v252_v46  ;;  %v751_v48 = vpop.f32.mrb[1].mxu1 }
 0x375   : > { %v255_v49 = vpop.f32.mrb[2].mxu1 }
 0x376   : > { %260 = vst.msk [vmem:[%s944_s27] sm:$0xf] %vm259_vm3, %v258_v47  ;;  %v752_v50 = vpop.f32.mrb[3].mxu1 }
 0x37b   : > { %v313_v51 = vpop.f32.mrb[4].mxu1 }
 0x37c   : > { %v314_v52 = vadd.f32 %v313_v51, %v909_v9  ;;  %v757_v53 = vpop.f32.mrb[5].mxu1 }
 0x37d   : > { %v316_v54 = vpop.f32.mrb[6].mxu1 }
 0x37e   : > { %v758_v55 = vpop.f32.mrb[7].mxu1  ;;  %v319_v56 = vsel %vm150_vm1, %v314_v52, -inf }
 0x37f   : > { %320 = vmax.xlane.f32.xlu1 %v319_v56 }
 0x383   : > { %v440_v57 = vpop.f32.mrb[8].mxu1 }
 0x384   : > { %v441_v58 = vadd.f32 %v440_v57, %v909_v9  ;;  %v769_v59 = vpop.f32.mrb[9].mxu1 }
 0x385   : > { %v443_v60 = vpop.f32.mrb[10].mxu1 }
 0x386   : > { %v446_v61 = vsel %vm150_vm1, %v441_v58, -inf  ;;  %v770_v62 = vpop.f32.mrb[11].mxu1 }
 0x387   : > { %447 = vmax.xlane.f32.xlu0 %v446_v61 }
 0x38b   : > { %v567_v63 = vpop.f32.mrb[12].mxu1 }
 0x38c   : > { %v568_v1 = vadd.f32 %v567_v63, %v909_v9  ;;  %v781_v2 = vpop.f32.mrb[13].mxu1 }
 0x38d   : > { %v570_v3 = vpop.f32.mrb[14].mxu1 }
 0x38e   : > { %v573_v4 = vsel %vm150_vm1, %v568_v1, -inf  ;;  %v782_v5 = vpop.f32.mrb[15].mxu1 }
 0x38f   : > { %574 = vmax.xlane.f32.xlu1 %v573_v4 }
 0x40c   : > { %v321_v6 = vpop.xlane.xlu1 %320 }
 0x40d   : > { %v322_v8 = vsub.f32 %v314_v52, %v321_v6 }
 0x40f   : > { %v323_v10 = vmul.f32 1.442695, %v322_v8 }
 0x411   : > { %821 = vpow2.f32 %v323_v10 }
 0x414   : > { %v448_v18 = vpop.xlane.xlu0 %447 }
 0x415   : > { %v449_v19 = vsub.f32 %v441_v58, %v448_v18 }
 0x417   : > { %v450_v20 = vmul.f32 1.442695, %v449_v19 }
 0x41b   : > { %v822_v11 = vpop.eup %821 }
 0x41c   : > { %v575_v12 = vpop.xlane.xlu1 %574  ;;  %v325_v13 = vsel %vm150_vm1, %v822_v11, 0.0 }
 0x41d   : > { %v576_v14 = vsub.f32 %v568_v1, %v575_v12  ;;  %326 = vadd.xlane.f32.xlu1 %v325_v13 }
 0x41f   : > { %v577_v15 = vmul.f32 1.442695, %v576_v14 }
 0x421   : > { %823 = vpow2.f32 %v577_v15 }
 0x422   : > { %825 = vpow2.f32 %v450_v20 }
 0x42b   : > { %v824_v16 = vpop.eup %823 }
 0x42c   : > { %v579_v9 = vsel %vm150_vm1, %v824_v16, 0.0  ;;  %v826_v21 = vpop.eup %825 }
 0x42d   : > { %580 = vadd.xlane.f32.xlu0 %v579_v9  ;;  %v452_v22 = vsel %vm150_vm1, %v826_v21, 0.0 }
 0x42e   : > { %331 = vrot.lane.b32.xlu1 %v903_v7, %s851_s28 }
 0x443   : > { %458 = vrot.lane.b32.xlu0 %v921_v28, %s852_s29 }
 0x452   : > { %453 = vadd.xlane.f32.xlu1 %v452_v22 }
 0x463   : > { %585 = vrot.lane.b32.xlu1 %v914_v17, %s853_s30 }
 0x4aa   : > { %v327_v23 = vpop.xlane.xlu1 %326 }
 0x4ab   : > { %827 = vrcp.f32 %v327_v23 }
 0x4ae   : > { %v332_v24 = vpop.permute.xlu1 %331 }
 0x4af   : > { %v337_v25 = vsel %vm214_vm2, %v332_v24, 0 }
 0x4b0   : > { %760 = vmatpush3.bf16.msra.mxu0 %v337_v25 }
 0x4b1   : > { %771 = vmatprep.subr.bf16.mxu0 %v841_v0 }
 0x4b5   : > { %v828_v7 = vpop.eup %827 }
 0x4b6   : > { %v329_v26 = vmul.f32 %v828_v7, %v822_v11 }
 0x4b8   : > { %v330_v27 = vpack.c.bf16 %v329_v26, %v329_v26 }
 0x4ba   : > { %762 = vmatmul.mubr.msk.bf16.vlgmr.msra.gmra.mrb[4].mxu0 %vm150_vm1, %v330_v27  ;;  %v581_v28 = vpop.xlane.xlu0 %580 }
 0x4bb   : > { %773 = vmatprep.mubr.msk.bf16.mxu0 %vm842_vm0, %v841_v0 }
 0x4be   : > { %v459_v29 = vpop.permute.xlu0 %458 }
 0x4bf   : > { %v464_v17 = vsel %vm214_vm2, %v459_v29, 0 }
 0x4c0   : > { %772 = vmatpush3.bf16.msra.mxu0 %v464_v17 }
 0x4c1   : > { %783 = vmatprep.subr.bf16.mxu0 %v841_v0 }
 0x4df   : > { %v454_v30 = vpop.xlane.xlu1 %453 }
 0x4e0   : > { %829 = vrcp.f32 %v454_v30 }
 0x4e1   : > { %831 = vrcp.f32 %v581_v28 }
 0x4e3   : > { %v586_v32 = vpop.permute.xlu1 %585 }
 0x4e4   : > { %v591_v34 = vsel %vm214_vm2, %v586_v32, 0 }
 0x4ea   : > { %v830_v31 = vpop.eup %829 }
 0x4eb   : > { %v456_v33 = vmul.f32 %v830_v31, %v826_v21  ;;  %v832_v36 = vpop.eup %831 }
 0x4ec   : > { %v583_v37 = vmul.f32 %v832_v36, %v824_v16 }
 0x4ed   : > { %v457_v35 = vpack.c.bf16 %v456_v33, %v456_v33 }
 0x4ee   : > { %v584_v38 = vpack.c.bf16 %v583_v37, %v583_v37 }
 0x4ef   : > { %774 = vmatmul.mubr.msk.bf16.vlgmr.msra.gmra.mrb[8].mxu0 %vm150_vm1, %v457_v35 }
 0x4f0   : > { %784 = vmatpush3.bf16.msra.mxu0 %v591_v34  ;;  %785 = vmatprep.mubr.msk.bf16.mxu0 %vm842_vm0, %v841_v0 }
 0x4f7   : > { %786 = vmatmul.mubr.msk.bf16.vlgmr.msra.gmra.mrb[12].mxu0 %vm150_vm1, %v584_v38 }
 0x58d   : > { %v373_v39 = vpop.f32.mrb[4].mxu0 }
 0x58e   : > { %v722_v40 = vpack.c.bf16 %v373_v39, %v373_v39  ;;  %v763_v41 = vpop.f32.mrb[5].mxu0 }
 0x58f   : > { %v376_v42 = vpop.f32.mrb[6].mxu0 }
 0x590   : > { %383 = vrot.lane.b32.xlu1 %v722_v40, %s854_s3  ;;  %v764_v43 = vpop.f32.mrb[7].mxu0 }
 0x5c2   : > { %v500_v44 = vpop.f32.mrb[8].mxu0 }
 0x5c3   : > { %v723_v45 = vpack.c.bf16 %v500_v44, %v500_v44  ;;  %v775_v46 = vpop.f32.mrb[9].mxu0 }
 0x5c4   : > { %v503_v47 = vpop.f32.mrb[10].mxu0 }
 0x5c5   : > { %510 = vrot.lane.b32.xlu0 %v723_v45, %s855_s4  ;;  %v776_v0 = vpop.f32.mrb[11].mxu0 }
 0x5ca   : > { %v627_v48 = vpop.f32.mrb[12].mxu0 }
 0x5cb   : > { %v724_v49 = vpack.c.bf16 %v627_v48, %v627_v48  ;;  %v787_v50 = vpop.f32.mrb[13].mxu0 }
 0x5cc   : > { %v630_v51 = vpop.f32.mrb[14].mxu0 }
 0x5cd   : > { %637 = vrot.lane.b32.xlu1 %v724_v49, %s856_s5  ;;  %v788_v52 = vpop.f32.mrb[15].mxu0 }
 0x602   : > { %v384_v53 = vpop.permute.xlu1 %383 }
 0x603   : > { %387 = vst.msk [vmem:[%s944_s27] sm:$0xf] %vm386_vm4, %v384_v53 }
 0x637   : > { %v511_v54 = vpop.permute.xlu0 %510 }
 0x638   : > { %514 = vst.msk [vmem:[%s944_s27] sm:$0xf] %vm513_vm5, %v511_v54 }
 0x63f   : > { %v638_v55 = vpop.permute.xlu1 %637 }
 0x640   : > { %641 = vst.msk [vmem:[%s944_s27] sm:$0xf] %vm640_vm6, %v638_v55 }
 0x641 PF: > { %s12_s9 = sadd.s32 1, %s839_s9  }
 0x642   : > { %p9_p4 = scmp.ge.s32.totalorder %s12_s9, 4  }
 0x644   :  { %11 = sbr.rel (!%p9_p4) target bundleno = 1 (0x1), region = 58 }

// kernel: transformer_decoder.20
= control target key start
LH: loop header
LB: loop body
LE: loop exit
PB: predicated region body
PF: predicated region fallthrough
CT: control target
= control target key end

     0   :  { %vm19_vm0 = vcmask 261120   ;;  %v150_v0 = vmov 0.0   ;;  %vm151_vm1 = vmmov 0   ;;  %vm118_vm2 = vcmask 257024   ;;  %s195_s1 = inlined_call_operand.vmem [shape: bf16[32,32], index: 1, kind: input, shape index: {}]   ;;  %s196_s0 = inlined_call_operand.vmem [shape: bf16[16,32], index: 0, kind: input, shape index: {}]   ;;  %s197_s2 = inlined_call_operand.vmem [shape: f32[1,32], index: 2, kind: input, shape index: {}]   ;;  %s198_s3 = inlined_call_operand.vmem [shape: bf16[16,32], index: 3, kind: output, shape index: {}]  }
   0x1   :  { %137 = vmatprep.subr.bf16.mxu0 %v150_v0  ;;  %v147_v1 = vld [vmem:[%s195_s1] sm:$0xff]   ;;  %141 = vmatprep.mubr.msk.bf16.mxu0 %vm151_vm1, %v150_v0  ;;  %20 = vst.msk [vmem:[#allocation2] sm:$0xff] %vm19_vm0, %v150_v0  ;;  %21 = vst.msk [vmem:[#allocation2 + $0x8] sm:$0xff] %vm19_vm0, %v150_v0  ;;  %v148_v2 = vld [vmem:[%s195_s1 + $0x8] sm:$0xff]  }
   0x2   :  { %138 = vmatpush3.bf16.msra.mxu0 %v147_v1  ;;  %v149_v3 = vld [vmem:[%s196_s0] sm:$0xff]  }
   0x3   :  { %139 = vmatprep.subr.bf16.mxu0 %v150_v0  ;;  %v129_v12 = vld [vmem:[%s197_s2] ss:$0 sm:$0xff] }
   0x6   :  { %140 = vmatpush3.bf16.msra.mxu0 %v148_v2 }
   0x8   :  { %v22_v4 = vld [vmem:[#allocation2] sm:$0xff]  ;;  %v23_v6 = vld [vmem:[#allocation2 + $0x8] sm:$0xff] }
   0x9   :  { %142 = vmatmul.mubr.msk.bf16.vlgmr.msra.gmra.mrb[0].mxu0 %vm19_vm0, %v149_v3 }
  0xdc   :  { %v85_v5 = vpop.f32.mrb[0].mxu0 }
  0xdd   :  { %v92_v7 = vadd.f32 %v85_v5, %v22_v4  ;;  %v143_v8 = vpop.f32.mrb[1].mxu0 }
  0xde   :  { %v88_v9 = vpop.f32.mrb[2].mxu0 }
  0xdf   :  { %94 = vst.msk [vmem:[#allocation2] sm:$0xff] %vm19_vm0, %v92_v7  ;;  %v93_v10 = vadd.f32 %v88_v9, %v23_v6  ;;  %v144_v11 = vpop.f32.mrb[3].mxu0 }
  0xe1   :  { %95 = vst.msk [vmem:[#allocation2 + $0x8] sm:$0xff] %vm19_vm0, %v93_v10 }
  0xe6   :  { %v99_v13 = vld [vmem:[#allocation2] sm:$0xff] }
  0xe7   :  { %v108_v14 = vadd.f32 %v129_v12, %v99_v13 }
  0xe8   :  { %v100_v15 = vld [vmem:[#allocation2 + $0x8] sm:$0xff] }
  0xe9   :  { %v132_v16 = vpack.c.bf16 %v108_v14, %v108_v14  ;;  %v109_v17 = vadd.f32 %v129_v12, %v100_v15 }
  0xeb   :  { %119 = vst.msk [vmem:[%s198_s3] sm:$0xf] %vm118_vm2, %v132_v16  ;;  %v133_v18 = vpack.c.bf16 %v109_v17, %v109_v17 }
  0xed   :  { %120 = vst.msk [vmem:[%s198_s3 + $0x4] sm:$0xf] %vm118_vm2, %v133_v18 }

// kernel: transformer_decoder.22
= control target key start
LH: loop header
LB: loop body
LE: loop exit
PB: predicated region body
PF: predicated region fallthrough
CT: control target
= control target key end

     0   :  { %s894_s9 = smov 0   ;;  %s993_s0 = inlined_call_operand.vmem [shape: bf16[2,8,32], index: 0, kind: input, shape index: {}]   ;;  %s994_s1 = inlined_call_operand.vmem [shape: bf16[2,8,64], index: 1, kind: input, shape index: {}]   ;;  %s995_s2 = inlined_call_operand.vmem [shape: bf16[2,8,32], index: 2, kind: output, shape index: {}]  }
   0x1 LB: > { %s724_s10 = sadd.s32 4294967295, %s865_s9   ;;  %p728_p0 = scmp.ge.s32.totalorder %s865_s9, 1  ;;  %s865_s9 = sphi %s894_s9, %s12_s9  }
   0x2   : > { %p120_p1 = scmp.lt.s32.totalorder %s865_s9, 3 }
   0x4   : > { %p121_p2 = pnand %p728_p0, %p120_p1 }
   0x5   : > { %p144_p3 = scmp.lt.s32.totalorder (!%p121_p2), %s724_s10, 1  ;;  %v867_v0 = vmov (!%p121_p2), 0.0   ;;  %vm868_vm0 = vmmov (!%p121_p2), 0   ;;  %vm161_vm1 = vcmask (!%p121_p2), 64512   ;;  %s869_s18 = smov (!%p121_p2), 96   ;;  %vm228_vm2 = vcmask (!%p121_p2), 1043456  }
   0x6   : > { %124 = sbr.rel (%p121_p2) target bundleno = 1436 (0x59c), region = 28  ;;  %771 = vmatprep.subr.bf16.mxu0 (!%p121_p2), %v867_v0  ;;  %773 = vmatprep.mubr.msk.bf16.mxu0 (!%p121_p2), %vm868_vm0, %v867_v0  ;;  %s870_s19 = smov (!%p121_p2), 120   ;;  %vm273_vm3 = vcmask (!%p121_p2), 60416   ;;  %vm401_vm4 = vcmask (!%p121_p2), 126016   ;;  %vm529_vm5 = vcmask (!%p121_p2), 191616   ;;  %vm657_vm6 = vcmask (!%p121_p2), 257216  }
   0x7   : > { %777 = vmatprep.subr.bf16.mxu1 (!%p121_p2), %v867_v0  ;;  %779 = vmatprep.mubr.msk.bf16.mxu1 (!%p121_p2), %vm868_vm0, %v867_v0  ;;  %s871_s20 = smov (!%p121_p2), 112   ;;  %s872_s21 = smov (!%p121_p2), 104  }
   0x8   : > { %s873_s25 = smov (!%p121_p2), 88   ;;  %s874_s26 = smov (!%p121_p2), 72  }
   0x9   : > { %s875_s27 = smov (!%p121_p2), 80   ;;  %s876_s28 = smov (!%p121_p2), 8  }
   0xa   : > { %s877_s29 = smov (!%p121_p2), 16   ;;  %s878_s30 = smov (!%p121_p2), 24  }
   0xd   : > { %s997_s10 = smov (!%p144_p3, %s724_s10), 1 }
   0xe   : > { %s908_s11 = sshll.u32 %s997_s10, 2 }
   0xf   : > { %s914_s14 = scalar_lea.vmem %s993_s0, %s908_s11  ;;  %s151_s17 = scalar_lea.vmem %s994_s1, %s908_s11 }
  0x10   : > { %v160_v1 = vld [vmem:[%s151_s17] sm:$0xf]  ;;  %s963_s24 = scalar_lea.vmem %s995_s2, %s908_s11 }
  0x11   : > { %v166_v2 = vsel %vm161_vm1, %v160_v1, 0  ;;  %v158_v3 = vld [vmem:[%s914_s14] sm:$0xf]  ;;  %v733_v10 = vcombine.low %v160_v1, %v160_v1 }
  0x12   : > { %772 = vmatpush3.bf16.xpose.msra.mxu0 %v166_v2  ;;  %v159_v4 = vmul.bf16 1052065461, %v158_v3  ;;  %v927_v11 = vld [vmem:[%s151_s17] ss:$0 sps:$4 sm:$0xff]  }
  0x13   : > { %789 = vmatprep.subr.bf16.mxu0 %v867_v0  ;;  %223 = vrot.lane.b32.xlu1 %v733_v10, %s869_s18  ;;  %v931_v12 = vld [vmem:[%s151_s17] ss:$0 sps:$4 sm:$0xff]  }
  0x14   : > { %v403_v13 = vld [vmem:[%s914_s14] sm:$0xf] }
  0x15   : > { %v404_v14 = vmul.bf16 1052065461, %v403_v13  ;;  %v531_v15 = vld [vmem:[%s914_s14] sm:$0xf] }
  0x16   : > { %v936_v17 = vld [vmem:[%s151_s17] ss:$0 sps:$4 sm:$0xff]   ;;  %v532_v18 = vmul.bf16 1052065461, %v531_v15 }
  0x17   : > { %286 = vrot.lane.b32.xlu1 %v927_v11, %s870_s19  ;;  %v740_v16 = vcombine.low %v404_v14, %v404_v14  ;;  %v275_v25 = vld [vmem:[%s914_s14] sm:$0xf] }
  0x18   : > { %v745_v19 = vcombine.low %v532_v18, %v532_v18  ;;  %v276_v26 = vmul.bf16 1052065461, %v275_v25 }
  0x19   : > { %774 = vmatmul.mubr.msk.bf16.vlgmr.msra.gmra.mrb[0].mxu0 %vm161_vm1, %v159_v4 }
  0x1a   : > { %791 = vmatprep.mubr.msk.bf16.mxu0 %vm868_vm0, %v867_v0  ;;  %v735_v29 = vcombine.low %v276_v26, %v276_v26 }
  0x1b   : > { %414 = vrot.lane.b32.xlu1 %v931_v12, %s871_s20 }
  0x1f   : > { %409 = vrot.lane.b32.xlu1 %v740_v16, %s871_s20 }
  0x23   : > { %542 = vrot.lane.b32.xlu1 %v936_v17, %s872_s21 }
  0x27   : > { %537 = vrot.lane.b32.xlu1 %v745_v19, %s872_s21 }
  0x85   : > { %v224_v27 = vpop.permute.xlu1 %223 }
  0x86   : > { %v230_v28 = vsel %vm228_vm2, %v224_v27, 0 }
  0x87   : > { %778 = vmatpush3.bf16.msra.mxu1 %v230_v28 }
  0x88   : > { %783 = vmatprep.subr.bf16.mxu1 %v867_v0 }
  0x89   : > { %v287_v32 = vpop.permute.xlu1 %286 }
  0x8a   : > { %v292_v34 = vsel %vm161_vm1, %v287_v32, 0 }
  0x8d   : > { %v415_v36 = vpop.permute.xlu1 %414 }
  0x8e   : > { %v420_v39 = vsel %vm161_vm1, %v415_v36, 0 }
  0x91   : > { %v410_v38 = vpop.permute.xlu1 %409 }
  0x95   : > { %v543_v40 = vpop.permute.xlu1 %542 }
  0x96   : > { %v548_v41 = vsel %vm161_vm1, %v543_v40, 0 }
  0x99   : > { %v538_v42 = vpop.permute.xlu1 %537 }
  0xec   : > { %v202_v5 = vpop.f32.mrb[0].mxu0 }
  0xed   : > { %v775_v6 = vpop.f32.mrb[1].mxu0  ;;  %v208_v7 = vsel %vm161_vm1, %v202_v5, -inf }
  0xee   : > { %209 = vmax.xlane.f32.xlu0 %v208_v7  ;;  %v205_v8 = vpop.f32.mrb[2].mxu0 }
  0xef   : > { %v776_v9 = vpop.f32.mrb[3].mxu0 }
 0x17b   : > { %v210_v20 = vpop.xlane.xlu0 %209 }
 0x17c   : > { %v211_v21 = vsub.f32 %v202_v5, %v210_v20 }
 0x17e   : > { %v212_v22 = vmul.f32 1.442695, %v211_v21 }
 0x180   : > { %843 = vpow2.f32 %v212_v22 }
 0x18a   : > { %v844_v23 = vpop.eup %843 }
 0x18b   : > { %v214_v24 = vsel %vm161_vm1, %v844_v23, 0.0 }
 0x18c   : > { %215 = vadd.xlane.f32.xlu0 %v214_v24 }
 0x1a2   : > { %281 = vrot.lane.b32.xlu0 %v735_v29, %s870_s19 }
 0x219   : > { %v216_v30 = vpop.xlane.xlu0 %215 }
 0x21a   : > { %845 = vrcp.f32 %v216_v30 }
 0x21d   : > { %v282_v37 = vpop.permute.xlu0 %281 }
 0x224   : > { %v846_v31 = vpop.eup %845 }
 0x225   : > { %v218_v33 = vmul.f32 %v846_v31, %v844_v23 }
 0x227   : > { %v219_v35 = vpack.c.bf16 %v218_v33, %v218_v33 }
 0x229   : > { %780 = vmatmul.mubr.msk.bf16.vlgmr.msra.gmra.mrb[0].mxu1 %vm161_vm1, %v219_v35 }
 0x22a   : > { %784 = vmatpush3.bf16.xpose.msra.mxu1 %v292_v34  ;;  %785 = vmatprep.mubr.msk.bf16.mxu1 %vm868_vm0, %v867_v0 }
 0x22b   : > { %795 = vmatprep.subr.bf16.mxu1 %v867_v0 }
 0x231   : > { %786 = vmatmul.mubr.msk.bf16.vlgmr.msra.gmra.mrb[4].mxu1 %vm161_vm1, %v282_v37 }
 0x232   : > { %796 = vmatpush3.bf16.xpose.msra.mxu1 %v420_v39  ;;  %797 = vmatprep.mubr.msk.bf16.mxu1 %vm868_vm0, %v867_v0 }
 0x233   : > { %807 = vmatprep.subr.bf16.mxu1 %v867_v0 }
 0x239   : > { %798 = vmatmul.mubr.msk.bf16.vlgmr.msra.gmra.mrb[8].mxu1 %vm161_vm1, %v410_v38 }
 0x23a   : > { %808 = vmatpush3.bf16.xpose.msra.mxu1 %v548_v41  ;;  %809 = vmatprep.mubr.msk.bf16.mxu1 %vm868_vm0, %v867_v0 }
 0x241   : > { %810 = vmatmul.mubr.msk.bf16.vlgmr.msra.gmra.mrb[12].mxu1 %vm161_vm1, %v538_v42 }
 0x2fc   : > { %v266_v43 = vpop.f32.mrb[0].mxu1 }
 0x2fd   : > { %v272_v44 = vpack.c.bf16 %v266_v43, %v266_v43  ;;  %v781_v45 = vpop.f32.mrb[1].mxu1 }
 0x2fe   : > { %v269_v46 = vpop.f32.mrb[2].mxu1 }
 0x2ff   : > { %274 = vst.msk [vmem:[%s963_s24] sm:$0xf] %vm273_vm3, %v272_v44  ;;  %v782_v47 = vpop.f32.mrb[3].mxu1 }
 0x304   : > { %v328_v48 = vpop.f32.mrb[4].mxu1 }
 0x305   : > { %v787_v49 = vpop.f32.mrb[5].mxu1  ;;  %v334_v50 = vsel %vm161_vm1, %v328_v48, -inf }
 0x306   : > { %335 = vmax.xlane.f32.xlu1 %v334_v50  ;;  %v331_v51 = vpop.f32.mrb[6].mxu1 }
 0x307   : > { %v788_v52 = vpop.f32.mrb[7].mxu1 }
 0x30c   : > { %v456_v53 = vpop.f32.mrb[8].mxu1 }
 0x30d   : > { %v799_v54 = vpop.f32.mrb[9].mxu1  ;;  %v462_v55 = vsel %vm161_vm1, %v456_v53, -inf }
 0x30e   : > { %463 = vmax.xlane.f32.xlu0 %v462_v55  ;;  %v459_v56 = vpop.f32.mrb[10].mxu1 }
 0x30f   : > { %v800_v57 = vpop.f32.mrb[11].mxu1 }
 0x314   : > { %v584_v58 = vpop.f32.mrb[12].mxu1 }
 0x315   : > { %v811_v59 = vpop.f32.mrb[13].mxu1  ;;  %v590_v60 = vsel %vm161_vm1, %v584_v58, -inf }
 0x316   : > { %591 = vmax.xlane.f32.xlu1 %v590_v60  ;;  %v587_v61 = vpop.f32.mrb[14].mxu1 }
 0x317   : > { %v812_v62 = vpop.f32.mrb[15].mxu1 }
 0x327   : > { %346 = vrot.lane.b32.xlu1 %v927_v11, %s873_s25 }
 0x393   : > { %v336_v63 = vpop.xlane.xlu1 %335 }
 0x394   : > { %v337_v1 = vsub.f32 %v328_v48, %v336_v63 }
 0x396   : > { %v338_v2 = vmul.f32 1.442695, %v337_v1 }
 0x398   : > { %847 = vpow2.f32 %v338_v2 }
 0x39b   : > { %v464_v3 = vpop.xlane.xlu0 %463 }
 0x39c   : > { %v465_v4 = vsub.f32 %v456_v53, %v464_v3 }
 0x39e   : > { %v466_v5 = vmul.f32 1.442695, %v465_v4 }
 0x3a0   : > { %849 = vpow2.f32 %v466_v5 }
 0x3a2   : > { %v848_v6 = vpop.eup %847 }
 0x3a3   : > { %v592_v7 = vpop.xlane.xlu1 %591  ;;  %v340_v8 = vsel %vm161_vm1, %v848_v6, 0.0 }
 0x3a4   : > { %v593_v9 = vsub.f32 %v584_v58, %v592_v7  ;;  %341 = vadd.xlane.f32.xlu0 %v340_v8 }
 0x3a6   : > { %v594_v10 = vmul.f32 1.442695, %v593_v9 }
 0x3a7   : > { %v347_v13 = vpop.permute.xlu1 %346 }
 0x3a8   : > { %851 = vpow2.f32 %v594_v10  ;;  %v352_v14 = vsel %vm228_vm2, %v347_v13, 0 }
 0x3a9   : > { %790 = vmatpush3.bf16.msra.mxu0 %v352_v14 }
 0x3aa   : > { %v850_v11 = vpop.eup %849  ;;  %801 = vmatprep.subr.bf16.mxu0 %v867_v0 }
 0x3ab   : > { %v468_v15 = vsel %vm161_vm1, %v850_v11, 0.0 }
 0x3ac   : > { %469 = vadd.xlane.f32.xlu1 %v468_v15 }
 0x3b2   : > { %v852_v16 = vpop.eup %851 }
 0x3b3   : > { %v596_v18 = vsel %vm161_vm1, %v852_v16, 0.0 }
 0x3b4   : > { %597 = vadd.xlane.f32.xlu0 %v596_v18 }
 0x3bd   : > { %602 = vrot.lane.b32.xlu1 %v936_v17, %s874_s26 }
 0x3ca   : > { %474 = vrot.lane.b32.xlu0 %v931_v12, %s875_s27 }
 0x431   : > { %v342_v19 = vpop.xlane.xlu0 %341 }
 0x432   : > { %853 = vrcp.f32 %v342_v19 }
 0x439   : > { %v470_v20 = vpop.xlane.xlu1 %469 }
 0x43a   : > { %855 = vrcp.f32 %v470_v20 }
 0x43c   : > { %v854_v21 = vpop.eup %853 }
 0x43d   : > { %v344_v22 = vmul.f32 %v854_v21, %v848_v6  ;;  %v603_v27 = vpop.permute.xlu1 %602 }
 0x43e   : > { %v608_v29 = vsel %vm228_vm2, %v603_v27, 0 }
 0x43f   : > { %v345_v23 = vpack.c.bf16 %v344_v22, %v344_v22 }
 0x441   : > { %v598_v24 = vpop.xlane.xlu0 %597  ;;  %792 = vmatmul.mubr.msk.bf16.vlgmr.msra.gmra.mrb[4].mxu0 %vm161_vm1, %v345_v23 }
 0x442   : > { %857 = vrcp.f32 %v598_v24  ;;  %803 = vmatprep.mubr.msk.bf16.mxu0 %vm868_vm0, %v867_v0 }
 0x444   : > { %v856_v25 = vpop.eup %855 }
 0x445   : > { %v472_v26 = vmul.f32 %v856_v25, %v850_v11  ;;  %v475_v17 = vpop.permute.xlu0 %474 }
 0x446   : > { %v480_v12 = vsel %vm228_vm2, %v475_v17, 0 }
 0x447   : > { %802 = vmatpush3.bf16.msra.mxu0 %v480_v12  ;;  %v473_v28 = vpack.c.bf16 %v472_v26, %v472_v26 }
 0x448   : > { %813 = vmatprep.subr.bf16.mxu0 %v867_v0 }
 0x44a   : > { %804 = vmatmul.mubr.msk.bf16.vlgmr.msra.gmra.mrb[8].mxu0 %vm161_vm1, %v473_v28 }
 0x44b   : > { %814 = vmatpush3.bf16.msra.mxu0 %v608_v29  ;;  %815 = vmatprep.mubr.msk.bf16.mxu0 %vm868_vm0, %v867_v0 }
 0x44c   : > { %v858_v30 = vpop.eup %857 }
 0x44d   : > { %v600_v31 = vmul.f32 %v858_v30, %v852_v16 }
 0x44f   : > { %v601_v32 = vpack.c.bf16 %v600_v31, %v600_v31 }
 0x452   : > { %816 = vmatmul.mubr.msk.bf16.vlgmr.msra.gmra.mrb[12].mxu0 %vm161_vm1, %v601_v32 }
 0x514   : > { %v388_v33 = vpop.f32.mrb[4].mxu0 }
 0x515   : > { %v752_v34 = vpack.c.bf16 %v388_v33, %v388_v33  ;;  %v793_v35 = vpop.f32.mrb[5].mxu0 }
 0x516   : > { %v391_v36 = vpop.f32.mrb[6].mxu0 }
 0x517   : > { %398 = vrot.lane.b32.xlu1 %v752_v34, %s876_s28  ;;  %v794_v37 = vpop.f32.mrb[7].mxu0 }
 0x51d   : > { %v516_v38 = vpop.f32.mrb[8].mxu0 }
 0x51e   : > { %v753_v39 = vpack.c.bf16 %v516_v38, %v516_v38  ;;  %v805_v40 = vpop.f32.mrb[9].mxu0 }
 0x51f   : > { %v519_v41 = vpop.f32.mrb[10].mxu0 }
 0x520   : > { %526 = vrot.lane.b32.xlu0 %v753_v39, %s877_s29  ;;  %v806_v0 = vpop.f32.mrb[11].mxu0 }
 0x525   : > { %v644_v42 = vpop.f32.mrb[12].mxu0 }
 0x526   : > { %v754_v43 = vpack.c.bf16 %v644_v42, %v644_v42  ;;  %v817_v44 = vpop.f32.mrb[13].mxu0 }
 0x527   : > { %v647_v45 = vpop.f32.mrb[14].mxu0 }
 0x528   : > { %654 = vrot.lane.b32.xlu1 %v754_v43, %s878_s30  ;;  %v818_v46 = vpop.f32.mrb[15].mxu0 }
 0x589   : > { %v399_v47 = vpop.permute.xlu1 %398 }
 0x58a   : > { %402 = vst.msk [vmem:[%s963_s24] sm:$0xf] %vm401_vm4, %v399_v47 }
 0x592   : > { %v527_v48 = vpop.permute.xlu0 %526 }
 0x593   : > { %530 = vst.msk [vmem:[%s963_s24] sm:$0xf] %vm529_vm5, %v527_v48 }
 0x59a   : > { %v655_v49 = vpop.permute.xlu1 %654 }
 0x59b   : > { %658 = vst.msk [vmem:[%s963_s24] sm:$0xf] %vm657_vm6, %v655_v49 }
 0x59c PF: > { %s12_s9 = sadd.s32 1, %s865_s9  }
 0x59d   : > { %p9_p4 = scmp.ge.s32.totalorder %s12_s9, 4  }
 0x59f   :  { %11 = sbr.rel (!%p9_p4) target bundleno = 1 (0x1), region = 61 }

// kernel: transformer_decoder.33
= control target key start
LH: loop header
LB: loop body
LE: loop exit
PB: predicated region body
PF: predicated region fallthrough
CT: control target
= control target key end

     0   :  { %vm19_vm0 = vcmask 261120   ;;  %s170_s0 = inlined_call_operand.vmem [shape: bf16[16,32], index: 0, kind: input, shape index: {}]   ;;  %s171_s1 = inlined_call_operand.vmem [shape: f32[1,32], index: 1, kind: input, shape index: {}]   ;;  %s172_s2 = inlined_call_operand.vmem [shape: f32[1,32], index: 2, kind: input, shape index: {}]   ;;  %s173_s3 = inlined_call_operand.hbm [shape: f32[16,32], index: 3, kind: output, shape index: {}]  }
   0x1   :  { %v86_v0 = vld [vmem:[%s170_s0] sm:$0xff]  }
   0x2   :  { %8 = vsyncpa [#allocation3], 0  ;;  %v87_v1 = vunpack.c.l.bf16 %v86_v0  ;;  %v88_v2 = vunpack.c.h.bf16 %v86_v0  ;;  %v83_v22 = vld [vmem:[%s171_s1] ss:$0 sm:$0xff]  ;;  %s120_s17 = smov [#allocation2]  }
   0x3   :  { %v84_v24 = vld [vmem:[%s172_s2] ss:$0 sm:$0xff]  ;;  %s72_s18 = sshll.u32 %s120_s17, 4  ;;  %s73_s18 = int_to_ptr.vmem [resolvable:$true] %s72_s18 }
   0x4   :  { %v20_v3 = vsel %vm19_vm0, %v87_v1, 0.0  ;;  %v23_v4 = vsel %vm19_vm0, %v88_v2, 0.0  ;;  %s96_s19 = scalar_lea.vmem %s73_s18, 256  ;;  %p101_p1 = scmp.lt.s32.totalorder %s73_s18, %s73_s18 }
   0x5   :  { %21 = vadd.xlane.f32.xlu0 %v20_v3  ;;  %p97_p0 = scmp.ne.s32.totalorder %s73_s18, %s96_s19  ;;  %p102_p2 = scmp.lt.s32.totalorder %s96_s19, %s96_s19 }
   0x7   :  { %p103_p3 = por %p102_p2, %p101_p1 }
   0x9   :  { %24 = vadd.xlane.f32.xlu0 %v23_v4  ;;  %p104_p4 = pnand %p103_p3, %p97_p0 }
  0x92   :  { %v22_v5 = vpop.xlane.xlu0 %21 }
  0x93   :  { %v27_v6 = vmul.f32 0.03125, %v22_v5 }
  0x95   :  { %v29_v7 = vsub.f32 %v87_v1, %v27_v6 }
  0x96   :  { %v25_v8 = vpop.xlane.xlu0 %24 }
  0x97   :  { %v28_v9 = vmul.f32 0.03125, %v25_v8  ;;  %v31_v10 = vmul.f32 %v29_v7, %v29_v7 }
  0x99   :  { %v30_v11 = vsub.f32 %v88_v2, %v28_v9  ;;  %v33_v12 = vsel %vm19_vm0, %v31_v10, 0.0 }
  0x9a   :  { %34 = vadd.xlane.f32.xlu1 %v33_v12 }
  0x9b   :  { %v32_v13 = vmul.f32 %v30_v11, %v30_v11 }
  0x9d   :  { %v36_v14 = vsel %vm19_vm0, %v32_v13, 0.0 }
  0x9e   :  { %37 = vadd.xlane.f32.xlu1 %v36_v14 }
 0x127   :  { %v35_v15 = vpop.xlane.xlu1 %34 }
 0x128   :  { %v39_v16 = vmul.f32 0.03125, %v35_v15 }
 0x12a   :  { %v41_v17 = vadd.f32 1e-05, %v39_v16 }
 0x12b   :  { %v38_v18 = vpop.xlane.xlu1 %37 }
 0x12c   :  { %92 = vrsqrt.f32 %v41_v17  ;;  %v40_v19 = vmul.f32 0.03125, %v38_v18 }
 0x12e   :  { %v42_v20 = vadd.f32 1e-05, %v40_v19 }
 0x130   :  { %94 = vrsqrt.f32 %v42_v20 }
 0x136   :  { %v93_v21 = vpop.eup %92 }
 0x137   :  { %v45_v23 = vmul.f32 %v93_v21, %v29_v7 }
 0x139   :  { %v54_v25 = vmul.f32 %v83_v22, %v45_v23 }
 0x13a   :  { %v95_v26 = vpop.eup %94 }
 0x13b   :  { %v46_v27 = vmul.f32 %v95_v26, %v30_v11  ;;  %v63_v28 = vadd.f32 %v84_v24, %v54_v25 }
 0x13d   :  { %v55_v29 = vmul.f32 %v83_v22, %v46_v27  ;;  %65 = vst.msk [vmem:[#allocation2] sm:$0xff] %vm19_vm0, %v63_v28 }
 0x13f   :  { %v64_v30 = vadd.f32 %v84_v24, %v55_v29 }
 0x141   :  { %66 = vst.msk [vmem:[#allocation2 + $0x8] sm:$0xff] %vm19_vm0, %v64_v30 }
 0x142   :  { %107 = shalt.err (!%p104_p4)
}
 0x143   :  { %s108_s20 = scalar_lea.hbm %s173_s3, 256 }
 0x144   :  { %p109_p5 = scmp.ne.s32.totalorder %s173_s3, %s108_s20  ;;  %p112_p6 = scmp.lt.u32.totalorder %s108_s20, %s173_s3 }
 0x146   :  { %p114_p7 = pnand %p112_p6, %p109_p5 }
 0x148   :  { %117 = shalt.err (!%p114_p7)
}
 0x149   :  { %s121_s25 = smov 128   ;;  %s122_s26 = smov 8  }
 0x14a   :  { %78 = dma.vmem_to_hbm [thread:$0]  %s73_s18, 256, %s173_s3, [#allocation3], %s121_s25, %s121_s25, %s122_s26  }
 0x14b   :  { %118 = dma.done.wait [#allocation3], 256  }
 0x14c   :  { %119 = vsyncadd [#allocation3], 4294967040 }
 0x14d   :  { %82 = vsyncpa [#allocation3], 1 }

// kernel: transformer_decoder.24
= control target key start
LH: loop header
LB: loop body
LE: loop exit
PB: predicated region body
PF: predicated region fallthrough
CT: control target
= control target key end

     0   :  { %vm31_vm0 = vcmask 261120   ;;  %v337_v0 = vmov 0.0   ;;  %vm338_vm1 = vmmov 0   ;;  %vm146_vm2 = vcmask 523264   ;;  %s430_s1 = inlined_call_operand.vmem [shape: bf16[32,64], index: 1, kind: input, shape index: {}]   ;;  %s431_s3 = inlined_call_operand.vmem [shape: bf16[64,32], index: 3, kind: input, shape index: {}]   ;;  %s432_s0 = inlined_call_operand.vmem [shape: bf16[16,32], index: 0, kind: input, shape index: {}]   ;;  %s433_s2 = inlined_call_operand.vmem [shape: f32[1,64], index: 2, kind: input, shape index: {}]   ;;  %s434_s4 = inlined_call_operand.vmem [shape: f32[1,32], index: 4, kind: input, shape index: {}]   ;;  %s435_s5 = inlined_call_operand.vmem [shape: f32[1,32], index: 5, kind: input, shape index: {}]   ;;  %s436_s6 = inlined_call_operand.vmem [shape: f32[1,32], index: 6, kind: input, shape index: {}]   ;;  %s437_s7 = inlined_call_operand.vmem [shape: bf16[16,32], index: 7, kind: output, shape index: {}]  }
   0x1   :  { %304 = vmatprep.subr.bf16.mxu0 %v337_v0  ;;  %v326_v1 = vld [vmem:[%s430_s1] sm:$0xff]   ;;  %308 = vmatprep.mubr.msk.bf16.mxu0 %vm338_vm1, %v337_v0  ;;  %32 = vst.msk [vmem:[#allocation2] sm:$0xff] %vm31_vm0, %v337_v0  ;;  %33 = vst.msk [vmem:[#allocation2 + $0x8] sm:$0xff] %vm31_vm0, %v337_v0  ;;  %v327_v2 = vld [vmem:[%s430_s1 + $0x8] sm:$0xff]   ;;  %vm268_vm3 = vcmask 257024  }
   0x2   :  { %312 = vmatprep.subr.bf16.mxu1 %v337_v0  ;;  %320 = vmatprep.mubr.msk.bf16.mxu1 %vm338_vm1, %v337_v0  ;;  %v329_v3 = vld [vmem:[%s431_s3] sm:$0xff]   ;;  %v330_v5 = vld [vmem:[%s431_s3 + $0x8] sm:$0xff]   ;;  %v331_v6 = vld [vmem:[%s431_s3 + $0x10] sm:$0xff]  }
   0x3   :  { %305 = vmatpush3.bf16.msra.mxu0 %v326_v1  ;;  %v328_v4 = vld [vmem:[%s432_s0] sm:$0xff]   ;;  %313 = vmatpush3.bf16.msra.mxu1 %v329_v3  ;;  %v332_v7 = vld [vmem:[%s431_s3 + $0x18] sm:$0xff]  }
   0x4   :  { %306 = vmatprep.subr.bf16.mxu0 %v337_v0  ;;  %314 = vmatprep.subr.bf16.mxu1 %v337_v0  ;;  %v275_v8 = vld [vmem:[%s433_s2] ss:$0 sm:$0xff] }
   0x5   :  { %v293_v26 = vld [vmem:[%s432_s0] sm:$0xff]  }
   0x6   :  { %v285_v27 = vld [vmem:[%s434_s4] ss:$0 sm:$0xff]  ;;  %v294_v28 = vunpack.c.l.bf16 %v293_v26  ;;  %v295_v31 = vunpack.c.h.bf16 %v293_v26 }
   0x7   :  { %307 = vmatpush3.bf16.msra.mxu0 %v327_v2  ;;  %315 = vmatpush3.bf16.msra.mxu1 %v330_v5  ;;  %v286_v55 = vld [vmem:[%s435_s5] ss:$0 sm:$0xff] }
   0x8   :  { %316 = vmatprep.subr.bf16.mxu1 %v337_v0  ;;  %v111_v18 = vld [vmem:[#allocation2] sm:$0xff]  ;;  %v112_v20 = vld [vmem:[#allocation2 + $0x8] sm:$0xff] }
   0x9   :  { %v287_v57 = vld [vmem:[%s436_s6] ss:$0 sm:$0xff] }
   0xa   :  { %309 = vmatmul.mubr.msk.bf16.vlgmr.msra.gmra.mrb[0].mxu0 %vm31_vm0, %v328_v4 }
   0xb   :  { %317 = vmatpush3.bf16.msra.mxu1 %v331_v6 }
   0xc   :  { %318 = vmatprep.subr.bf16.mxu1 %v337_v0 }
   0xf   :  { %319 = vmatpush3.bf16.msra.mxu1 %v332_v7 }
  0xdd   :  { %v102_v9 = vpop.f32.mrb[0].mxu0 }
  0xde   :  { %v103_v10 = vadd.f32 %v275_v8, %v102_v9  ;;  %v310_v11 = vpop.f32.mrb[1].mxu0 }
  0xdf   :  { %v105_v12 = vpop.f32.mrb[2].mxu0 }
  0xe0   :  { %v106_v13 = vadd.f32 %v275_v8, %v105_v12  ;;  %v311_v14 = vpop.f32.mrb[3].mxu0  ;;  %v109_v15 = vmax.f32 %v103_v10, 0.0 }
  0xe2   :  { %v110_v16 = vmax.f32 %v106_v13, 0.0 }
  0xe4   :  { %v113_v17 = vpack.c.bf16 %v110_v16, %v109_v15 }
  0xe6   :  { %321 = vmatmul.mubr.msk.bf16.vlgmr.msra.gmra.mrb[0].mxu1 %vm146_vm2, %v113_v17 }
 0x1b9   :  { %v184_v19 = vpop.f32.mrb[0].mxu1 }
 0x1ba   :  { %v191_v21 = vadd.f32 %v184_v19, %v111_v18  ;;  %v322_v22 = vpop.f32.mrb[1].mxu1 }
 0x1bb   :  { %v187_v23 = vpop.f32.mrb[2].mxu1 }
 0x1bc   :  { %193 = vst.msk [vmem:[#allocation2] sm:$0xff] %vm31_vm0, %v191_v21  ;;  %v192_v24 = vadd.f32 %v187_v23, %v112_v20  ;;  %v323_v25 = vpop.f32.mrb[3].mxu1 }
 0x1be   :  { %194 = vst.msk [vmem:[#allocation2 + $0x8] sm:$0xff] %vm31_vm0, %v192_v24 }
 0x1c3   :  { %v198_v29 = vld [vmem:[#allocation2] sm:$0xff] }
 0x1c4   :  { %v207_v30 = vadd.f32 %v285_v27, %v198_v29 }
 0x1c5   :  { %v199_v32 = vld [vmem:[#allocation2 + $0x8] sm:$0xff] }
 0x1c6   :  { %v213_v33 = vadd.f32 %v294_v28, %v207_v30  ;;  %v208_v34 = vadd.f32 %v285_v27, %v199_v32 }
 0x1c8   :  { %v215_v35 = vsel %vm31_vm0, %v213_v33, 0.0  ;;  %v214_v36 = vadd.f32 %v295_v31, %v208_v34 }
 0x1c9   :  { %216 = vadd.xlane.f32.xlu0 %v215_v35 }
 0x1ca   :  { %v218_v37 = vsel %vm31_vm0, %v214_v36, 0.0 }
 0x1cd   :  { %219 = vadd.xlane.f32.xlu0 %v218_v37 }
 0x256   :  { %v217_v38 = vpop.xlane.xlu0 %216 }
 0x257   :  { %v222_v39 = vmul.f32 0.03125, %v217_v38 }
 0x259   :  { %v224_v40 = vsub.f32 %v213_v33, %v222_v39 }
 0x25a   :  { %v220_v41 = vpop.xlane.xlu0 %219 }
 0x25b   :  { %v223_v42 = vmul.f32 0.03125, %v220_v41  ;;  %v226_v43 = vmul.f32 %v224_v40, %v224_v40 }
 0x25d   :  { %v225_v44 = vsub.f32 %v214_v36, %v223_v42  ;;  %v228_v45 = vsel %vm31_vm0, %v226_v43, 0.0 }
 0x25e   :  { %229 = vadd.xlane.f32.xlu1 %v228_v45 }
 0x25f   :  { %v227_v46 = vmul.f32 %v225_v44, %v225_v44 }
 0x261   :  { %v231_v47 = vsel %vm31_vm0, %v227_v46, 0.0 }
 0x262   :  { %232 = vadd.xlane.f32.xlu1 %v231_v47 }
 0x2eb   :  { %v230_v48 = vpop.xlane.xlu1 %229 }
 0x2ec   :  { %v234_v49 = vmul.f32 0.03125, %v230_v48 }
 0x2ee   :  { %v236_v50 = vadd.f32 1e-05, %v234_v49 }
 0x2ef   :  { %v233_v51 = vpop.xlane.xlu1 %232 }
 0x2f0   :  { %333 = vrsqrt.f32 %v236_v50  ;;  %v235_v52 = vmul.f32 0.03125, %v233_v51 }
 0x2f2   :  { %v237_v53 = vadd.f32 1e-05, %v235_v52 }
 0x2f4   :  { %335 = vrsqrt.f32 %v237_v53 }
 0x2fa   :  { %v334_v54 = vpop.eup %333 }
 0x2fb   :  { %v240_v56 = vmul.f32 %v334_v54, %v224_v40 }
 0x2fd   :  { %v249_v58 = vmul.f32 %v286_v55, %v240_v56 }
 0x2fe   :  { %v336_v59 = vpop.eup %335 }
 0x2ff   :  { %v258_v60 = vadd.f32 %v287_v57, %v249_v58  ;;  %v241_v61 = vmul.f32 %v336_v59, %v225_v44 }
 0x301   :  { %v290_v62 = vpack.c.bf16 %v258_v60, %v258_v60  ;;  %v250_v63 = vmul.f32 %v286_v55, %v241_v61 }
 0x303   :  { %269 = vst.msk [vmem:[%s437_s7] sm:$0xf] %vm268_vm3, %v290_v62  ;;  %v259_v0 = vadd.f32 %v287_v57, %v250_v63 }
 0x305   :  { %v291_v1 = vpack.c.bf16 %v259_v0, %v259_v0 }
 0x307   :  { %270 = vst.msk [vmem:[%s437_s7 + $0x4] sm:$0xf] %vm268_vm3, %v291_v1 }

</bundles_post_ra>
